<compile_context>
chip_gen: v6e
topology: v6e:2x2x1
jax: 0.10.0
libtpu: 0.0.40
codegen_flags: <defaults>
</compile_context>

<pallas_src>
import functools
import math

import jax
import jax.numpy as jnp
from jax.experimental import pallas as pl
from jax.experimental.pallas import tpu as pltpu

_BF16 = jnp.bfloat16
_LN_EPS = 1e-5            # matches torch.nn.LayerNorm default
_NEG = -1e30              # causal-mask fill (f32 scores)
_VMEM_LIMIT = 48 * 1024 * 1024   # <= v7x 64 MiB physical, > v5e/v6e default scoped

_P1 = pltpu.CompilerParams(dimension_semantics=("parallel",),
                           vmem_limit_bytes=_VMEM_LIMIT)
_P2 = pltpu.CompilerParams(dimension_semantics=("parallel", "parallel"),
                           vmem_limit_bytes=_VMEM_LIMIT)
_PRED = pltpu.CompilerParams(dimension_semantics=("parallel", "arbitrary"),
                             vmem_limit_bytes=_VMEM_LIMIT)


def _row_tile(m):
    # Row tile for the M = B*S dimension; 512 rows amortizes per-grid-step overhead
    # (relevant on v7x's 3.2 TB/s HBM).  Small demo shapes use the full extent.
    return min(512, m)


def _pinned(shape):
    """BlockSpec for a grid-invariant (pinned) block: index_map == 0, single buffer."""
    index_map = lambda *_: (0,) * len(shape)
    try:
        return pl.BlockSpec(shape, index_map, pipeline_mode=pl.Buffered(1))
    except Exception:  # older Pallas without pipeline_mode / Buffered
        return pl.BlockSpec(shape, index_map)


def _layernorm(h, gamma, beta, eps):
    # LayerNorm over the last dim, statistics in f32.
    mu = jnp.mean(h, axis=-1, keepdims=True)
    d = h - mu
    var = jnp.mean(d * d, axis=-1, keepdims=True)
    return d * jax.lax.rsqrt(var + eps) * gamma + beta


# ----------------------------- Pallas kernels ------------------------------

def _qkv_split_kernel(x_ref, w_ref, b_ref, q_ref, kv_ref, *, d_model):
    # Fused QKV projection: (TM, D) @ (D, 3D) + (1, 3D); outputs split into
    # Q (TM, D) and packed KV (TM, 2D), both bf16, consumed directly by attention.
    y = jnp.dot(x_ref[...].astype(_BF16), w_ref[...],
                preferred_element_type=jnp.float32) + b_ref[...]
    q_ref[...] = y[:, :d_model].astype(q_ref.dtype)
    kv_ref[...] = y[:, d_model:].astype(kv_ref.dtype)


def _kv_proj_kernel(x_ref, w_ref, b_ref, o_ref):
    # Cross-attention fused KV projection: (TM, D) @ (D, 2D) + (1, 2D) -> bf16.
    o_ref[...] = (jnp.dot(x_ref[...].astype(_BF16), w_ref[...],
                          preferred_element_type=jnp.float32)
                  + b_ref[...]).astype(o_ref.dtype)


def _attn_kernel(q_ref, kv_ref, o_ref, *, num_heads, causal):
    # One (batch, Sq-tile) per grid step; lane-dense slabs, heads sliced in-kernel,
    # each head's context stored straight into its o_ref lane slice.
    # TODO(synk): flash-style Sk tiling (online softmax, causal block skipping) for
    # long sequences; at these sizes whole K/V per batch is cheapest.
    q = q_ref[0]                       # (tq, D) bf16, 1/sqrt(Dh) folded into Wq
    kv = kv_ref[0]                     # (Sk, 2D) bf16, packed [K | V]
    tq, d = q.shape
    sk = kv.shape[0]
    dh = d // num_heads

    if causal:
        q0 = pl.program_id(1) * tq
        row = q0 + jax.lax.broadcasted_iota(jnp.int32, (tq, sk), 0)
        col = jax.lax.broadcasted_iota(jnp.int32, (tq, sk), 1)
        visible = col <= row

    for h in range(num_heads):          # static unroll over heads
        qh = q[:, h * dh:(h + 1) * dh]
        kh = kv[:, h * dh:(h + 1) * dh]
        vh = kv[:, d + h * dh:d + (h + 1) * dh]
        # Q @ K^T without materializing a transpose (NT matmul on the MXU).
        s = jax.lax.dot_general(qh, kh, (((1,), (1,)), ((), ())),
                                preferred_element_type=jnp.float32)
        if causal:
            s = jnp.where(visible, s, _NEG)
        s = s - jnp.max(s, axis=-1, keepdims=True)
        p = jnp.exp(s)
        p = p * pl.reciprocal(jnp.sum(p, axis=-1, keepdims=True), approx=True)
        ctx_h = jnp.dot(p.astype(_BF16), vh, preferred_element_type=jnp.float32)
        o_ref[0, :, h * dh:(h + 1) * dh] = ctx_h.astype(o_ref.dtype)


def _proj_add_ln_kernel(ctx_ref, res_ref, wo_ref, bo_ref, g_ref, beta_ref, o_ref,
                        *, eps):
    # Attention output projection + residual add + LayerNorm, fused.
    proj = jnp.dot(ctx_ref[...], wo_ref[...],
                   preferred_element_type=jnp.float32) + bo_ref[...]
    o_ref[...] = _layernorm(res_ref[...] + proj, g_ref[...], beta_ref[...], eps)


def _proj_add_ln_q_kernel(ctx_ref, res_ref, wo_ref, bo_ref, g_ref, beta_ref,
                          wq_ref, bq_ref, o_ref, q_ref, *, eps):
    # Same as above, plus the cross-attention Q projection fused on the LN output
    # (saves one HBM write+read of x1 and one pallas_call).
    proj = jnp.dot(ctx_ref[...], wo_ref[...],
                   preferred_element_type=jnp.float32) + bo_ref[...]
    x1 = _layernorm(res_ref[...] + proj, g_ref[...], beta_ref[...], eps)
    o_ref[...] = x1
    q_ref[...] = (jnp.dot(x1.astype(_BF16), wq_ref[...],
                          preferred_element_type=jnp.float32)
                  + bq_ref[...]).astype(q_ref.dtype)


def _ffn_add_ln_kernel(x_ref, w1_ref, b1_ref, w2_ref, b2_ref, g_ref, beta_ref,
                       o_ref, acc_ref, *, eps):
    # FFN with Dff-tiled reduction: per step compute relu(x @ W1[:, tile] + b1[tile])
    # and accumulate its product with W2[tile, :] into an f32 VMEM scratch.
    # Residual add + LayerNorm fused into the final reduction step.
    j = pl.program_id(1)
    x = x_ref[...]

    @pl.when(j == 0)
    def _():
        acc_ref[...] = jnp.zeros_like(acc_ref)

    h = jnp.dot(x.astype(_BF16), w1_ref[...],
                preferred_element_type=jnp.float32) + b1_ref[...]
    h = jnp.maximum(h, 0.0)
    acc_ref[...] += jnp.dot(h.astype(_BF16), w2_ref[...],
                            preferred_element_type=jnp.float32)

    @pl.when(j == pl.num_programs(1) - 1)
    def _():
        y = acc_ref[...] + b2_ref[...]
        o_ref[...] = _layernorm(x + y, g_ref[...], beta_ref[...], eps)


# ------------------------------ Pallas wrappers ----------------------------

def qkv_self_proj(x2d, w_qkv, b_qkv, d_model):
    m, d = x2d.shape
    tm = _row_tile(m)
    kern = functools.partial(_qkv_split_kernel, d_model=d_model)
    return pl.pallas_call(
        kern,
        out_shape=(jax.ShapeDtypeStruct((m, d_model), _BF16),
                   jax.ShapeDtypeStruct((m, 2 * d_model), _BF16)),
        grid=(pl.cdiv(m, tm),),
        in_specs=[
            pl.BlockSpec((tm, d), lambda i: (i, 0)),
            _pinned((d, 3 * d_model)),
            _pinned((1, 3 * d_model)),
        ],
        out_specs=(
            pl.BlockSpec((tm, d_model), lambda i: (i, 0)),
            pl.BlockSpec((tm, 2 * d_model), lambda i: (i, 0)),
        ),
        compiler_params=_P1,
    )(x2d, w_qkv, b_qkv)


def kv_proj(x2d, w_kv, b_kv):
    m, d = x2d.shape
    dout = w_kv.shape[1]
    tm = _row_tile(m)
    return pl.pallas_call(
        _kv_proj_kernel,
        out_shape=jax.ShapeDtypeStruct((m, dout), _BF16),
        grid=(pl.cdiv(m, tm),),
        in_specs=[
            pl.BlockSpec((tm, d), lambda i: (i, 0)),
            _pinned((d, dout)),
            _pinned((1, dout)),
        ],
        out_specs=pl.BlockSpec((tm, dout), lambda i: (i, 0)),
        compiler_params=_P1,
    )(x2d, w_kv, b_kv)


def attention(q3, kv3, num_heads, causal):
    # q3: (B, Sq, D) bf16; kv3: (B, Sk, 2D) bf16 packed [K | V].
    b, sq, d = q3.shape
    sk = kv3.shape[1]
    tq = min(256, sq)
    kern = functools.partial(_attn_kernel, num_heads=num_heads, causal=causal)
    return pl.pallas_call(
        kern,
        out_shape=jax.ShapeDtypeStruct((b, sq, d), _BF16),
        grid=(b, pl.cdiv(sq, tq)),
        in_specs=[
            pl.BlockSpec((1, tq, d), lambda bi, qi: (bi, qi, 0)),
            pl.BlockSpec((1, sk, 2 * d), lambda bi, qi: (bi, 0, 0)),
        ],
        out_specs=pl.BlockSpec((1, tq, d), lambda bi, qi: (bi, qi, 0)),
        compiler_params=_P2,
    )(q3, kv3)


def proj_add_ln(ctx2d, res2d, wo, bo, gamma, beta, eps=_LN_EPS):
    m, d = ctx2d.shape
    tm = _row_tile(m)
    kern = functools.partial(_proj_add_ln_kernel, eps=eps)
    return pl.pallas_call(
        kern,
        out_shape=jax.ShapeDtypeStruct((m, d), jnp.float32),
        grid=(pl.cdiv(m, tm),),
        in_specs=[
            pl.BlockSpec((tm, d), lambda i: (i, 0)),
            pl.BlockSpec((tm, d), lambda i: (i, 0)),
            _pinned((d, d)),
            _pinned((1, d)),
            _pinned((1, d)),
            _pinned((1, d)),
        ],
        out_specs=pl.BlockSpec((tm, d), lambda i: (i, 0)),
        compiler_params=_P1,
    )(ctx2d, res2d, wo, bo, gamma, beta)


def proj_add_ln_q(ctx2d, res2d, wo, bo, gamma, beta, wq, bq, eps=_LN_EPS):
    m, d = ctx2d.shape
    tm = _row_tile(m)
    kern = functools.partial(_proj_add_ln_q_kernel, eps=eps)
    return pl.pallas_call(
        kern,
        out_shape=(jax.ShapeDtypeStruct((m, d), jnp.float32),
                   jax.ShapeDtypeStruct((m, d), _BF16)),
        grid=(pl.cdiv(m, tm),),
        in_specs=[
            pl.BlockSpec((tm, d), lambda i: (i, 0)),
            pl.BlockSpec((tm, d), lambda i: (i, 0)),
            _pinned((d, d)),
            _pinned((1, d)),
            _pinned((1, d)),
            _pinned((1, d)),
            _pinned((d, d)),
            _pinned((1, d)),
        ],
        out_specs=(
            pl.BlockSpec((tm, d), lambda i: (i, 0)),
            pl.BlockSpec((tm, d), lambda i: (i, 0)),
        ),
        compiler_params=_P1,
    )(ctx2d, res2d, wo, bo, gamma, beta, wq, bq)


def ffn_add_ln(x2d, w1, b1, w2, b2, gamma, beta, eps=_LN_EPS):
    m, d = x2d.shape
    dff = w1.shape[1]
    tm = _row_tile(m)
    tff = min(1024, dff)     # assumes dff % tff == 0 (typical model dims)
    kern = functools.partial(_ffn_add_ln_kernel, eps=eps)
    return pl.pallas_call(
        kern,
        out_shape=jax.ShapeDtypeStruct((m, d), jnp.float32),
        grid=(pl.cdiv(m, tm), pl.cdiv(dff, tff)),
        in_specs=[
            pl.BlockSpec((tm, d), lambda i, j: (i, 0)),
            pl.BlockSpec((d, tff), lambda i, j: (0, j)),
            pl.BlockSpec((1, tff), lambda i, j: (0, j)),
            pl.BlockSpec((tff, d), lambda i, j: (j, 0)),
            _pinned((1, d)),
            _pinned((1, d)),
            _pinned((1, d)),
        ],
        out_specs=pl.BlockSpec((tm, d), lambda i, j: (i, 0)),
        scratch_shapes=[pltpu.VMEM((tm, d), jnp.float32)],
        compiler_params=_PRED,
    )(x2d, w1, b1, w2, b2, gamma, beta)


# ----------------------------- DecoderLayer glue ---------------------------

def decoder_layer(X, encoder_output, params, num_heads):
    # Dropout is identity (inference).  tgt_mask == causal, src_mask == None.
    B, S, D = X.shape
    Se = encoder_output.shape[1]
    M = B * S
    x2 = X.reshape(M, D)

    sa = params["self_attn"]
    ca = params["cross_attn"]

    # ---- self masked attention + add&norm (+ fused cross-Q projection) ----
    q, kv = qkv_self_proj(x2, sa["w_qkv"], sa["b_qkv"], D)
    ctx = attention(q.reshape(B, S, D), kv.reshape(B, S, 2 * D), num_heads, causal=True)
    x1, qc = proj_add_ln_q(ctx.reshape(M, D), x2, sa["wo"], sa["bo"],
                           params["ln1_g"], params["ln1_b"], ca["wq"], ca["bq"])

    # ---- encoder-decoder attention + add&norm ----
    kvc = kv_proj(encoder_output.reshape(B * Se, D), ca["w_kv"], ca["b_kv"])
    ctx2 = attention(qc.reshape(B, S, D), kvc.reshape(B, Se, 2 * D), num_heads,
                     causal=False)
    x2n = proj_add_ln(ctx2.reshape(M, D), x1, ca["wo"], ca["bo"],
                      params["ln2_g"], params["ln2_b"])

    # ---- feed-forward + add&norm ----
    x3 = ffn_add_ln(x2n, params["ffn_w1"], params["ffn_b1"],
                    params["ffn_w2"], params["ffn_b2"],
                    params["ln3_g"], params["ln3_b"])
    return x3.reshape(B, S, D)


# ------------------------------ parameters ----------------------------------

def init_params(key, d_model, num_heads, d_ff):
    def dense(k, fan_in, fan_out):
        kw, kb = jax.random.split(k)
        w = jax.random.normal(kw, (fan_in, fan_out), jnp.float32) / math.sqrt(fan_in)
        b = 0.01 * jax.random.normal(kb, (fan_out,), jnp.float32)
        return w, b

    def mha_params(k):
        ks = jax.random.split(k, 4)
        wq, bq = dense(ks[0], d_model, d_model)
        wk, bk = dense(ks[1], d_model, d_model)
        wv, bv = dense(ks[2], d_model, d_model)
        wo, bo = dense(ks[3], d_model, d_model)
        return dict(wq=wq, bq=bq, wk=wk, bk=bk, wv=wv, bv=bv, wo=wo, bo=bo)

    keys = jax.random.split(key, 4)
    w1, b1 = dense(keys[2], d_model, d_ff)
    w2, b2 = dense(keys[3], d_ff, d_model)
    return dict(
        self_attn=mha_params(keys[0]),
        cross_attn=mha_params(keys[1]),
        ffn_w1=w1, ffn_b1=b1, ffn_w2=w2, ffn_b2=b2,
        ln1_g=jnp.ones((d_model,), jnp.float32), ln1_b=jnp.zeros((d_model,), jnp.float32),
        ln2_g=jnp.ones((d_model,), jnp.float32), ln2_b=jnp.zeros((d_model,), jnp.float32),
        ln3_g=jnp.ones((d_model,), jnp.float32), ln3_b=jnp.zeros((d_model,), jnp.float32),
    )


def prepare_params(raw, num_heads):
    """Host-side fusion: concat QKV/KV weights, fold 1/sqrt(Dh) into W_q/b_q,
    cast weight matrices to bf16 (MXU inputs), keep biases / LN params in f32
    as lane-dense (1, D) rows."""
    d_model = raw["self_attn"]["wq"].shape[0]
    scale = 1.0 / math.sqrt(d_model // num_heads)

    def row(v):
        return v.reshape(1, -1)

    sa = raw["self_attn"]
    self_attn = dict(
        w_qkv=jnp.concatenate([sa["wq"] * scale, sa["wk"], sa["wv"]], axis=1).astype(_BF16),
        b_qkv=row(jnp.concatenate([sa["bq"] * scale, sa["bk"], sa["bv"]])),
        wo=sa["wo"].astype(_BF16), bo=row(sa["bo"]),
    )
    ca = raw["cross_attn"]
    cross_attn = dict(
        wq=(ca["wq"] * scale).astype(_BF16), bq=row(ca["bq"] * scale),
        w_kv=jnp.concatenate([ca["wk"], ca["wv"]], axis=1).astype(_BF16),
        b_kv=row(jnp.concatenate([ca["bk"], ca["bv"]])),
        wo=ca["wo"].astype(_BF16), bo=row(ca["bo"]),
    )
    return dict(
        self_attn=self_attn, cross_attn=cross_attn,
        ffn_w1=raw["ffn_w1"].astype(_BF16), ffn_b1=row(raw["ffn_b1"]),
        ffn_w2=raw["ffn_w2"].astype(_BF16), ffn_b2=row(raw["ffn_b2"]),
        ln1_g=row(raw["ln1_g"]), ln1_b=row(raw["ln1_b"]),
        ln2_g=row(raw["ln2_g"]), ln2_b=row(raw["ln2_b"]),
        ln3_g=row(raw["ln3_g"]), ln3_b=row(raw["ln3_b"]),
    )


# --------------------------------- main -------------------------------------

if __name__ == "__main__":
    B, S, S_ENC = 2, 8, 8
    D_MODEL, NUM_HEADS, D_FF = 32, 4, 64

    key = jax.random.PRNGKey(0)
    k_x, k_enc, k_p = jax.random.split(key, 3)
    X = jax.random.normal(k_x, (B, S, D_MODEL), jnp.float32)
    enc_out = jax.random.normal(k_enc, (B, S_ENC, D_MODEL), jnp.float32)
    params = prepare_params(init_params(k_p, D_MODEL, NUM_HEADS, D_FF), NUM_HEADS)

    decoder_fn = jax.jit(decoder_layer, static_argnums=(3,))
    out = decoder_fn(X, enc_out, params, NUM_HEADS)
    out = jax.block_until_ready(out)

    assert out.shape == (B, S, D_MODEL) and out.dtype == jnp.float32
    assert bool(jnp.all(jnp.isfinite(out)))
    print("KERNEL_OK")
</pallas_src>

<mosaic_0001>
module attributes {stable_mosaic.version = 11 : i64} {
  func.func @_kv_proj_kernel(%arg0: i32, %arg1: memref<16x32xf32, #tpu.memory_space<vmem>>, %arg2: memref<32x64xbf16, #tpu.memory_space<vmem>>, %arg3: memref<1x64xf32, #tpu.memory_space<vmem>>, %arg4: memref<16x64xbf16, #tpu.memory_space<vmem>>) attributes {dimension_semantics = [#tpu.dimension_semantics<parallel>], iteration_bounds = array<i64: 1>, scalar_prefetch = 0 : i64, scratch_operands = 0 : i64, tpu.core_type = #tpu.core_type<tc>, window_params = [{transform_indices = @transform_0, window_bounds = array<i64: 16, 32>}, {pipeline_mode = #tpu.pipeline_mode<synchronous>, transform_indices = @transform_1, window_bounds = array<i64: 32, 64>}, {pipeline_mode = #tpu.pipeline_mode<synchronous>, transform_indices = @transform_2, window_bounds = array<i64: 1, 64>}, {transform_indices = @transform_3, window_bounds = array<i64: 16, 64>}]} {
    %c0 = arith.constant 0 : index
    %c0_0 = arith.constant 0 : index
    %0 = vector.load %arg1[%c0, %c0_0] : memref<16x32xf32, #tpu.memory_space<vmem>>, vector<16x32xf32>
    %1 = arith.truncf %0 : vector<16x32xf32> to vector<16x32xbf16>
    %c0_1 = arith.constant 0 : index
    %c0_2 = arith.constant 0 : index
    %2 = vector.load %arg2[%c0_1, %c0_2] : memref<32x64xbf16, #tpu.memory_space<vmem>>, vector<32x64xbf16>
    %cst = arith.constant dense<0.000000e+00> : vector<16x64xf32>
    %3 = tpu.matmul %1, %2, %cst {dimension_numbers = #tpu.dot_dimension_numbers<[1], [0], [0], [1], [0, 0, 1, 1], [], []>} : vector<16x32xbf16>, vector<32x64xbf16>, vector<16x64xf32> -> vector<16x64xf32>
    %c0_3 = arith.constant 0 : index
    %c0_4 = arith.constant 0 : index
    %4 = vector.load %arg3[%c0_3, %c0_4] : memref<1x64xf32, #tpu.memory_space<vmem>>, vector<1x64xf32>
    %5 = vector.broadcast %4 : vector<1x64xf32> to vector<16x64xf32>
    %6 = arith.addf %3, %5 : vector<16x64xf32>
    %7 = arith.truncf %6 : vector<16x64xf32> to vector<16x64xbf16>
    %c0_5 = arith.constant 0 : index
    %c0_6 = arith.constant 0 : index
    %8 = vector.load %arg4[%c0_5, %c0_6] : memref<16x64xbf16, #tpu.memory_space<vmem>>, vector<16x64xbf16>
    tpu.vector_store %arg4[%c0_5, %c0_6], %7 {strides = array<i32>} : memref<16x64xbf16, #tpu.memory_space<vmem>>, vector<16x64xbf16>,
    return
  }
  func.func @transform_0(%arg0: i32) -> (i32, i32) {
    %c0_i32 = arith.constant 0 : i32
    %c0_i32_0 = arith.constant 0 : i32
    return %arg0, %c0_i32 : i32, i32
  }
  func.func @transform_1(%arg0: i32) -> (i32, i32) {
    %c0_i32 = arith.constant 0 : i32
    %c0_i32_0 = arith.constant 0 : i32
    %c0_i32_1 = arith.constant 0 : i32
    return %c0_i32, %c0_i32_0 : i32, i32
  }
  func.func @transform_2(%arg0: i32) -> (i32, i32) {
    %c0_i32 = arith.constant 0 : i32
    %c0_i32_0 = arith.constant 0 : i32
    %c0_i32_1 = arith.constant 0 : i32
    return %c0_i32, %c0_i32_0 : i32, i32
  }
  func.func @transform_3(%arg0: i32) -> (i32, i32) {
    %c0_i32 = arith.constant 0 : i32
    %c0_i32_0 = arith.constant 0 : i32
    return %arg0, %c0_i32 : i32, i32
  }
}

module attributes {stable_mosaic.version = 11 : i64} {
  func.func @_qkv_split_kernel(%arg0: i32, %arg1: memref<16x32xf32, #tpu.memory_space<vmem>>, %arg2: memref<32x96xbf16, #tpu.memory_space<vmem>>, %arg3: memref<1x96xf32, #tpu.memory_space<vmem>>, %arg4: memref<16x32xbf16, #tpu.memory_space<vmem>>, %arg5: memref<16x64xbf16, #tpu.memory_space<vmem>>) attributes {dimension_semantics = [#tpu.dimension_semantics<parallel>], iteration_bounds = array<i64: 1>, scalar_prefetch = 0 : i64, scratch_operands = 0 : i64, tpu.core_type = #tpu.core_type<tc>, window_params = [{transform_indices = @transform_0, window_bounds = array<i64: 16, 32>}, {pipeline_mode = #tpu.pipeline_mode<synchronous>, transform_indices = @transform_1, window_bounds = array<i64: 32, 96>}, {pipeline_mode = #tpu.pipeline_mode<synchronous>, transform_indices = @transform_2, window_bounds = array<i64: 1, 96>}, {transform_indices = @transform_3, window_bounds = array<i64: 16, 32>}, {transform_indices = @transform_4, window_bounds = array<i64: 16, 64>}]} {
    %c0 = arith.constant 0 : index
    %c0_0 = arith.constant 0 : index
    %0 = vector.load %arg1[%c0, %c0_0] : memref<16x32xf32, #tpu.memory_space<vmem>>, vector<16x32xf32>
    %1 = arith.truncf %0 : vector<16x32xf32> to vector<16x32xbf16>
    %c0_1 = arith.constant 0 : index
    %c0_2 = arith.constant 0 : index
    %2 = vector.load %arg2[%c0_1, %c0_2] : memref<32x96xbf16, #tpu.memory_space<vmem>>, vector<32x96xbf16>
    %cst = arith.constant dense<0.000000e+00> : vector<16x96xf32>
    %3 = tpu.matmul %1, %2, %cst {dimension_numbers = #tpu.dot_dimension_numbers<[1], [0], [0], [1], [0, 0, 1, 1], [], []>} : vector<16x32xbf16>, vector<32x96xbf16>, vector<16x96xf32> -> vector<16x96xf32>
    %c0_3 = arith.constant 0 : index
    %c0_4 = arith.constant 0 : index
    %4 = vector.load %arg3[%c0_3, %c0_4] : memref<1x96xf32, #tpu.memory_space<vmem>>, vector<1x96xf32>
    %5 = vector.broadcast %4 : vector<1x96xf32> to vector<16x96xf32>
    %6 = arith.addf %3, %5 : vector<16x96xf32>
    %7 = vector.extract_strided_slice %6 {offsets = [0, 0], sizes = [16, 32], strides = [1, 1]} : vector<16x96xf32> to vector<16x32xf32>
    %8 = arith.truncf %7 : vector<16x32xf32> to vector<16x32xbf16>
    %c0_5 = arith.constant 0 : index
    %c0_6 = arith.constant 0 : index
    %9 = vector.load %arg4[%c0_5, %c0_6] : memref<16x32xbf16, #tpu.memory_space<vmem>>, vector<16x32xbf16>
    tpu.vector_store %arg4[%c0_5, %c0_6], %8 {strides = array<i32>} : memref<16x32xbf16, #tpu.memory_space<vmem>>, vector<16x32xbf16>,
    %10 = vector.extract_strided_slice %6 {offsets = [0, 32], sizes = [16, 64], strides = [1, 1]} : vector<16x96xf32> to vector<16x64xf32>
    %11 = arith.truncf %10 : vector<16x64xf32> to vector<16x64xbf16>
    %c0_7 = arith.constant 0 : index
    %c0_8 = arith.constant 0 : index
    %12 = vector.load %arg5[%c0_7, %c0_8] : memref<16x64xbf16, #tpu.memory_space<vmem>>, vector<16x64xbf16>
    tpu.vector_store %arg5[%c0_7, %c0_8], %11 {strides = array<i32>} : memref<16x64xbf16, #tpu.memory_space<vmem>>, vector<16x64xbf16>,
    return
  }
  func.func @transform_0(%arg0: i32) -> (i32, i32) {
    %c0_i32 = arith.constant 0 : i32
    %c0_i32_0 = arith.constant 0 : i32
    return %arg0, %c0_i32 : i32, i32
  }
  func.func @transform_1(%arg0: i32) -> (i32, i32) {
    %c0_i32 = arith.constant 0 : i32
    %c0_i32_0 = arith.constant 0 : i32
    %c0_i32_1 = arith.constant 0 : i32
    return %c0_i32, %c0_i32_0 : i32, i32
  }
  func.func @transform_2(%arg0: i32) -> (i32, i32) {
    %c0_i32 = arith.constant 0 : i32
    %c0_i32_0 = arith.constant 0 : i32
    %c0_i32_1 = arith.constant 0 : i32
    return %c0_i32, %c0_i32_0 : i32, i32
  }
  func.func @transform_3(%arg0: i32) -> (i32, i32) {
    %c0_i32 = arith.constant 0 : i32
    %c0_i32_0 = arith.constant 0 : i32
    return %arg0, %c0_i32 : i32, i32
  }
  func.func @transform_4(%arg0: i32) -> (i32, i32) {
    %c0_i32 = arith.constant 0 : i32
    %c0_i32_0 = arith.constant 0 : i32
    return %arg0, %c0_i32 : i32, i32
  }
}

module attributes {stable_mosaic.version = 11 : i64} {
  func.func @_attn_kernel(%arg0: i32, %arg1: i32, %arg2: memref<1x8x32xbf16, #tpu.memory_space<vmem>>, %arg3: memref<1x8x64xbf16, #tpu.memory_space<vmem>>, %arg4: memref<1x8x32xbf16, #tpu.memory_space<vmem>>) attributes {dimension_semantics = [#tpu.dimension_semantics<parallel>, #tpu.dimension_semantics<parallel>], iteration_bounds = array<i64: 2, 1>, scalar_prefetch = 0 : i64, scratch_operands = 0 : i64, tpu.core_type = #tpu.core_type<tc>, window_params = [{transform_indices = @transform_0, window_bounds = array<i64: 1, 8, 32>}, {transform_indices = @transform_1, window_bounds = array<i64: 1, 8, 64>}, {transform_indices = @transform_2, window_bounds = array<i64: 1, 8, 32>}]} {
    %c0 = arith.constant 0 : index
    %c0_0 = arith.constant 0 : index
    %c0_1 = arith.constant 0 : index
    %0 = vector.load %arg2[%c0, %c0_0, %c0_1] : memref<1x8x32xbf16, #tpu.memory_space<vmem>>, vector<1x8x32xbf16>
    %1 = vector.shape_cast %0 : vector<1x8x32xbf16> to vector<8x32xbf16>
    %c0_2 = arith.constant 0 : index
    %c0_3 = arith.constant 0 : index
    %c0_4 = arith.constant 0 : index
    %2 = vector.load %arg3[%c0_2, %c0_3, %c0_4] : memref<1x8x64xbf16, #tpu.memory_space<vmem>>, vector<1x8x64xbf16>
    %3 = vector.shape_cast %2 : vector<1x8x64xbf16> to vector<8x64xbf16>
    %c8_i32 = arith.constant 8 : i32
    %4 = arith.muli %arg1, %c8_i32 : i32
    %5 = tpu.iota {dimensions = array<i32: 0>} : vector<8x8xi32>
    %6 = vector.broadcast %4 : i32 to vector<8x8xi32>
    %7 = arith.addi %6, %5 : vector<8x8xi32>
    %8 = tpu.iota {dimensions = array<i32: 1>} : vector<8x8xi32>
    %9 = arith.cmpi sle, %8, %7 : vector<8x8xi32>
    %10 = vector.extract_strided_slice %1 {offsets = [0, 0], sizes = [8, 8], strides = [1, 1]} : vector<8x32xbf16> to vector<8x8xbf16>
    %11 = vector.extract_strided_slice %3 {offsets = [0, 0], sizes = [8, 8], strides = [1, 1]} : vector<8x64xbf16> to vector<8x8xbf16>
    %12 = vector.extract_strided_slice %3 {offsets = [0, 32], sizes = [8, 8], strides = [1, 1]} : vector<8x64xbf16> to vector<8x8xbf16>
    %cst = arith.constant dense<0.000000e+00> : vector<8x8xf32>
    %13 = tpu.matmul %10, %11, %cst {dimension_numbers = #tpu.dot_dimension_numbers<[1], [1], [0], [0], [0, 0, 1, 0], [], []>} : vector<8x8xbf16>, vector<8x8xbf16>, vector<8x8xf32> -> vector<8x8xf32>
    %cst_5 = arith.constant -1.000000e+30 : f32
    %14 = vector.broadcast %cst_5 : f32 to vector<8x8xf32>
    %15 = arith.select %9, %13, %14 : vector<8x8xi1>, vector<8x8xf32>
    %cst_6 = arith.constant dense<0xFF800000> : vector<8xf32>
    %16 = vector.multi_reduction <maximumf>, %15, %cst_6 [1] : vector<8x8xf32> to vector<8xf32>
    %17 = vector.shape_cast %16 : vector<8xf32> to vector<8x1xf32>
    %18 = vector.broadcast %17 : vector<8x1xf32> to vector<8x8xf32>
    %19 = arith.subf %15, %18 : vector<8x8xf32>
    %20 = math.exp %19 : vector<8x8xf32>
    %cst_7 = arith.constant dense<0.000000e+00> : vector<8xf32>
    %21 = vector.multi_reduction <add>, %20, %cst_7 [1] : vector<8x8xf32> to vector<8xf32>
    %22 = vector.shape_cast %21 : vector<8xf32> to vector<8x1xf32>
    %23 = tpu.reciprocal %22 {approx = true} : vector<8x1xf32> -> vector<8x1xf32>
    %24 = vector.broadcast %23 : vector<8x1xf32> to vector<8x8xf32>
    %25 = arith.mulf %20, %24 : vector<8x8xf32>
    %26 = arith.truncf %25 : vector<8x8xf32> to vector<8x8xbf16>
    %cst_8 = arith.constant dense<0.000000e+00> : vector<8x8xf32>
    %27 = tpu.matmul %26, %12, %cst_8 {dimension_numbers = #tpu.dot_dimension_numbers<[1], [0], [0], [1], [0, 0, 1, 1], [], []>} : vector<8x8xbf16>, vector<8x8xbf16>, vector<8x8xf32> -> vector<8x8xf32>
    %28 = arith.truncf %27 : vector<8x8xf32> to vector<8x8xbf16>
    %c0_9 = arith.constant 0 : index
    %c0_10 = arith.constant 0 : index
    %c0_11 = arith.constant 0 : index
    %29 = vector.load %arg4[%c0_9, %c0_10, %c0_11] : memref<1x8x32xbf16, #tpu.memory_space<vmem>>, vector<1x8x8xbf16>
    %30 = vector.shape_cast %29 : vector<1x8x8xbf16> to vector<8x8xbf16>
    %31 = vector.shape_cast %28 : vector<8x8xbf16> to vector<1x8x8xbf16>
    tpu.vector_store %arg4[%c0_9, %c0_10, %c0_11], %31 {strides = array<i32>} : memref<1x8x32xbf16, #tpu.memory_space<vmem>>, vector<1x8x8xbf16>,
    %32 = vector.extract_strided_slice %1 {offsets = [0, 8], sizes = [8, 8], strides = [1, 1]} : vector<8x32xbf16> to vector<8x8xbf16>
    %33 = vector.extract_strided_slice %3 {offsets = [0, 8], sizes = [8, 8], strides = [1, 1]} : vector<8x64xbf16> to vector<8x8xbf16>
    %34 = vector.extract_strided_slice %3 {offsets = [0, 40], sizes = [8, 8], strides = [1, 1]} : vector<8x64xbf16> to vector<8x8xbf16>
    %cst_12 = arith.constant dense<0.000000e+00> : vector<8x8xf32>
    %35 = tpu.matmul %32, %33, %cst_12 {dimension_numbers = #tpu.dot_dimension_numbers<[1], [1], [0], [0], [0, 0, 1, 0], [], []>} : vector<8x8xbf16>, vector<8x8xbf16>, vector<8x8xf32> -> vector<8x8xf32>
    %cst_13 = arith.constant -1.000000e+30 : f32
    %36 = vector.broadcast %cst_13 : f32 to vector<8x8xf32>
    %37 = arith.select %9, %35, %36 : vector<8x8xi1>, vector<8x8xf32>
    %cst_14 = arith.constant dense<0xFF800000> : vector<8xf32>
    %38 = vector.multi_reduction <maximumf>, %37, %cst_14 [1] : vector<8x8xf32> to vector<8xf32>
    %39 = vector.shape_cast %38 : vector<8xf32> to vector<8x1xf32>
    %40 = vector.broadcast %39 : vector<8x1xf32> to vector<8x8xf32>
    %41 = arith.subf %37, %40 : vector<8x8xf32>
    %42 = math.exp %41 : vector<8x8xf32>
    %cst_15 = arith.constant dense<0.000000e+00> : vector<8xf32>
    %43 = vector.multi_reduction <add>, %42, %cst_15 [1] : vector<8x8xf32> to vector<8xf32>
    %44 = vector.shape_cast %43 : vector<8xf32> to vector<8x1xf32>
    %45 = tpu.reciprocal %44 {approx = true} : vector<8x1xf32> -> vector<8x1xf32>
    %46 = vector.broadcast %45 : vector<8x1xf32> to vector<8x8xf32>
    %47 = arith.mulf %42, %46 : vector<8x8xf32>
    %48 = arith.truncf %47 : vector<8x8xf32> to vector<8x8xbf16>
    %cst_16 = arith.constant dense<0.000000e+00> : vector<8x8xf32>
    %49 = tpu.matmul %48, %34, %cst_16 {dimension_numbers = #tpu.dot_dimension_numbers<[1], [0], [0], [1], [0, 0, 1, 1], [], []>} : vector<8x8xbf16>, vector<8x8xbf16>, vector<8x8xf32> -> vector<8x8xf32>
    %50 = arith.truncf %49 : vector<8x8xf32> to vector<8x8xbf16>
    %c0_17 = arith.constant 0 : index
    %c0_18 = arith.constant 0 : index
    %c8 = arith.constant 8 : index
    %51 = vector.load %arg4[%c0_17, %c0_18, %c8] : memref<1x8x32xbf16, #tpu.memory_space<vmem>>, vector<1x8x8xbf16>
    %52 = vector.shape_cast %51 : vector<1x8x8xbf16> to vector<8x8xbf16>
    %53 = vector.shape_cast %50 : vector<8x8xbf16> to vector<1x8x8xbf16>
    tpu.vector_store %arg4[%c0_17, %c0_18, %c8], %53 {strides = array<i32>} : memref<1x8x32xbf16, #tpu.memory_space<vmem>>, vector<1x8x8xbf16>,
    %54 = vector.extract_strided_slice %1 {offsets = [0, 16], sizes = [8, 8], strides = [1, 1]} : vector<8x32xbf16> to vector<8x8xbf16>
    %55 = vector.extract_strided_slice %3 {offsets = [0, 16], sizes = [8, 8], strides = [1, 1]} : vector<8x64xbf16> to vector<8x8xbf16>
    %56 = vector.extract_strided_slice %3 {offsets = [0, 48], sizes = [8, 8], strides = [1, 1]} : vector<8x64xbf16> to vector<8x8xbf16>
    %cst_19 = arith.constant dense<0.000000e+00> : vector<8x8xf32>
    %57 = tpu.matmul %54, %55, %cst_19 {dimension_numbers = #tpu.dot_dimension_numbers<[1], [1], [0], [0], [0, 0, 1, 0], [], []>} : vector<8x8xbf16>, vector<8x8xbf16>, vector<8x8xf32> -> vector<8x8xf32>
    %cst_20 = arith.constant -1.000000e+30 : f32
    %58 = vector.broadcast %cst_20 : f32 to vector<8x8xf32>
    %59 = arith.select %9, %57, %58 : vector<8x8xi1>, vector<8x8xf32>
    %cst_21 = arith.constant dense<0xFF800000> : vector<8xf32>
    %60 = vector.multi_reduction <maximumf>, %59, %cst_21 [1] : vector<8x8xf32> to vector<8xf32>
    %61 = vector.shape_cast %60 : vector<8xf32> to vector<8x1xf32>
    %62 = vector.broadcast %61 : vector<8x1xf32> to vector<8x8xf32>
    %63 = arith.subf %59, %62 : vector<8x8xf32>
    %64 = math.exp %63 : vector<8x8xf32>
    %cst_22 = arith.constant dense<0.000000e+00> : vector<8xf32>
    %65 = vector.multi_reduction <add>, %64, %cst_22 [1] : vector<8x8xf32> to vector<8xf32>
    %66 = vector.shape_cast %65 : vector<8xf32> to vector<8x1xf32>
    %67 = tpu.reciprocal %66 {approx = true} : vector<8x1xf32> -> vector<8x1xf32>
    %68 = vector.broadcast %67 : vector<8x1xf32> to vector<8x8xf32>
    %69 = arith.mulf %64, %68 : vector<8x8xf32>
    %70 = arith.truncf %69 : vector<8x8xf32> to vector<8x8xbf16>
    %cst_23 = arith.constant dense<0.000000e+00> : vector<8x8xf32>
    %71 = tpu.matmul %70, %56, %cst_23 {dimension_numbers = #tpu.dot_dimension_numbers<[1], [0], [0], [1], [0, 0, 1, 1], [], []>} : vector<8x8xbf16>, vector<8x8xbf16>, vector<8x8xf32> -> vector<8x8xf32>
    %72 = arith.truncf %71 : vector<8x8xf32> to vector<8x8xbf16>
    %c0_24 = arith.constant 0 : index
    %c0_25 = arith.constant 0 : index
    %c16 = arith.constant 16 : index
    %73 = vector.load %arg4[%c0_24, %c0_25, %c16] : memref<1x8x32xbf16, #tpu.memory_space<vmem>>, vector<1x8x8xbf16>
    %74 = vector.shape_cast %73 : vector<1x8x8xbf16> to vector<8x8xbf16>
    %75 = vector.shape_cast %72 : vector<8x8xbf16> to vector<1x8x8xbf16>
    tpu.vector_store %arg4[%c0_24, %c0_25, %c16], %75 {strides = array<i32>} : memref<1x8x32xbf16, #tpu.memory_space<vmem>>, vector<1x8x8xbf16>,
    %76 = vector.extract_strided_slice %1 {offsets = [0, 24], sizes = [8, 8], strides = [1, 1]} : vector<8x32xbf16> to vector<8x8xbf16>
    %77 = vector.extract_strided_slice %3 {offsets = [0, 24], sizes = [8, 8], strides = [1, 1]} : vector<8x64xbf16> to vector<8x8xbf16>
    %78 = vector.extract_strided_slice %3 {offsets = [0, 56], sizes = [8, 8], strides = [1, 1]} : vector<8x64xbf16> to vector<8x8xbf16>
    %cst_26 = arith.constant dense<0.000000e+00> : vector<8x8xf32>
    %79 = tpu.matmul %76, %77, %cst_26 {dimension_numbers = #tpu.dot_dimension_numbers<[1], [1], [0], [0], [0, 0, 1, 0], [], []>} : vector<8x8xbf16>, vector<8x8xbf16>, vector<8x8xf32> -> vector<8x8xf32>
    %cst_27 = arith.constant -1.000000e+30 : f32
    %80 = vector.broadcast %cst_27 : f32 to vector<8x8xf32>
    %81 = arith.select %9, %79, %80 : vector<8x8xi1>, vector<8x8xf32>
    %cst_28 = arith.constant dense<0xFF800000> : vector<8xf32>
    %82 = vector.multi_reduction <maximumf>, %81, %cst_28 [1] : vector<8x8xf32> to vector<8xf32>
    %83 = vector.shape_cast %82 : vector<8xf32> to vector<8x1xf32>
    %84 = vector.broadcast %83 : vector<8x1xf32> to vector<8x8xf32>
    %85 = arith.subf %81, %84 : vector<8x8xf32>
    %86 = math.exp %85 : vector<8x8xf32>
    %cst_29 = arith.constant dense<0.000000e+00> : vector<8xf32>
    %87 = vector.multi_reduction <add>, %86, %cst_29 [1] : vector<8x8xf32> to vector<8xf32>
    %88 = vector.shape_cast %87 : vector<8xf32> to vector<8x1xf32>
    %89 = tpu.reciprocal %88 {approx = true} : vector<8x1xf32> -> vector<8x1xf32>
    %90 = vector.broadcast %89 : vector<8x1xf32> to vector<8x8xf32>
    %91 = arith.mulf %86, %90 : vector<8x8xf32>
    %92 = arith.truncf %91 : vector<8x8xf32> to vector<8x8xbf16>
    %cst_30 = arith.constant dense<0.000000e+00> : vector<8x8xf32>
    %93 = tpu.matmul %92, %78, %cst_30 {dimension_numbers = #tpu.dot_dimension_numbers<[1], [0], [0], [1], [0, 0, 1, 1], [], []>} : vector<8x8xbf16>, vector<8x8xbf16>, vector<8x8xf32> -> vector<8x8xf32>
    %94 = arith.truncf %93 : vector<8x8xf32> to vector<8x8xbf16>
    %c0_31 = arith.constant 0 : index
    %c0_32 = arith.constant 0 : index
    %c24 = arith.constant 24 : index
    %95 = vector.load %arg4[%c0_31, %c0_32, %c24] : memref<1x8x32xbf16, #tpu.memory_space<vmem>>, vector<1x8x8xbf16>
    %96 = vector.shape_cast %95 : vector<1x8x8xbf16> to vector<8x8xbf16>
    %97 = vector.shape_cast %94 : vector<8x8xbf16> to vector<1x8x8xbf16>
    tpu.vector_store %arg4[%c0_31, %c0_32, %c24], %97 {strides = array<i32>} : memref<1x8x32xbf16, #tpu.memory_space<vmem>>, vector<1x8x8xbf16>,
    return
  }
  func.func @transform_0(%arg0: i32, %arg1: i32) -> (i32, i32, i32) {
    %c0_i32 = arith.constant 0 : i32
    %c0_i32_0 = arith.constant 0 : i32
    return %arg0, %arg1, %c0_i32 : i32, i32, i32
  }
  func.func @transform_1(%arg0: i32, %arg1: i32) -> (i32, i32, i32) {
    %c0_i32 = arith.constant 0 : i32
    %c0_i32_0 = arith.constant 0 : i32
    %c0_i32_1 = arith.constant 0 : i32
    return %arg0, %c0_i32, %c0_i32_0 : i32, i32, i32
  }
  func.func @transform_2(%arg0: i32, %arg1: i32) -> (i32, i32, i32) {
    %c0_i32 = arith.constant 0 : i32
    %c0_i32_0 = arith.constant 0 : i32
    return %arg0, %arg1, %c0_i32 : i32, i32, i32
  }
}

module attributes {stable_mosaic.version = 11 : i64} {
  func.func @_proj_add_ln_q_kernel(%arg0: i32, %arg1: memref<16x32xbf16, #tpu.memory_space<vmem>>, %arg2: memref<16x32xf32, #tpu.memory_space<vmem>>, %arg3: memref<32x32xbf16, #tpu.memory_space<vmem>>, %arg4: memref<1x32xf32, #tpu.memory_space<vmem>>, %arg5: memref<1x32xf32, #tpu.memory_space<vmem>>, %arg6: memref<1x32xf32, #tpu.memory_space<vmem>>, %arg7: memref<32x32xbf16, #tpu.memory_space<vmem>>, %arg8: memref<1x32xf32, #tpu.memory_space<vmem>>, %arg9: memref<16x32xf32, #tpu.memory_space<vmem>>, %arg10: memref<16x32xbf16, #tpu.memory_space<vmem>>) attributes {dimension_semantics = [#tpu.dimension_semantics<parallel>], iteration_bounds = array<i64: 1>, scalar_prefetch = 0 : i64, scratch_operands = 0 : i64, tpu.core_type = #tpu.core_type<tc>, window_params = [{transform_indices = @transform_0, window_bounds = array<i64: 16, 32>}, {transform_indices = @transform_1, window_bounds = array<i64: 16, 32>}, {pipeline_mode = #tpu.pipeline_mode<synchronous>, transform_indices = @transform_2, window_bounds = array<i64: 32, 32>}, {pipeline_mode = #tpu.pipeline_mode<synchronous>, transform_indices = @transform_3, window_bounds = array<i64: 1, 32>}, {pipeline_mode = #tpu.pipeline_mode<synchronous>, transform_indices = @transform_4, window_bounds = array<i64: 1, 32>}, {pipeline_mode = #tpu.pipeline_mode<synchronous>, transform_indices = @transform_5, window_bounds = array<i64: 1, 32>}, {pipeline_mode = #tpu.pipeline_mode<synchronous>, transform_indices = @transform_6, window_bounds = array<i64: 32, 32>}, {pipeline_mode = #tpu.pipeline_mode<synchronous>, transform_indices = @transform_7, window_bounds = array<i64: 1, 32>}, {transform_indices = @transform_8, window_bounds = array<i64: 16, 32>}, {transform_indices = @transform_9, window_bounds = array<i64: 16, 32>}]} {
    %c0 = arith.constant 0 : index
    %c0_0 = arith.constant 0 : index
    %0 = vector.load %arg1[%c0, %c0_0] : memref<16x32xbf16, #tpu.memory_space<vmem>>, vector<16x32xbf16>
    %c0_1 = arith.constant 0 : index
    %c0_2 = arith.constant 0 : index
    %1 = vector.load %arg3[%c0_1, %c0_2] : memref<32x32xbf16, #tpu.memory_space<vmem>>, vector<32x32xbf16>
    %cst = arith.constant dense<0.000000e+00> : vector<16x32xf32>
    %2 = tpu.matmul %0, %1, %cst {dimension_numbers = #tpu.dot_dimension_numbers<[1], [0], [0], [1], [0, 0, 1, 1], [], []>} : vector<16x32xbf16>, vector<32x32xbf16>, vector<16x32xf32> -> vector<16x32xf32>
    %c0_3 = arith.constant 0 : index
    %c0_4 = arith.constant 0 : index
    %3 = vector.load %arg4[%c0_3, %c0_4] : memref<1x32xf32, #tpu.memory_space<vmem>>, vector<1x32xf32>
    %4 = vector.broadcast %3 : vector<1x32xf32> to vector<16x32xf32>
    %5 = arith.addf %2, %4 : vector<16x32xf32>
    %c0_5 = arith.constant 0 : index
    %c0_6 = arith.constant 0 : index
    %6 = vector.load %arg2[%c0_5, %c0_6] : memref<16x32xf32, #tpu.memory_space<vmem>>, vector<16x32xf32>
    %7 = arith.addf %6, %5 : vector<16x32xf32>
    %c0_7 = arith.constant 0 : index
    %c0_8 = arith.constant 0 : index
    %8 = vector.load %arg5[%c0_7, %c0_8] : memref<1x32xf32, #tpu.memory_space<vmem>>, vector<1x32xf32>
    %c0_9 = arith.constant 0 : index
    %c0_10 = arith.constant 0 : index
    %9 = vector.load %arg6[%c0_9, %c0_10] : memref<1x32xf32, #tpu.memory_space<vmem>>, vector<1x32xf32>
    %cst_11 = arith.constant dense<0.000000e+00> : vector<16xf32>
    %10 = vector.multi_reduction <add>, %7, %cst_11 [1] : vector<16x32xf32> to vector<16xf32>
    %11 = vector.shape_cast %10 : vector<16xf32> to vector<16x1xf32>
    %cst_12 = arith.constant 3.200000e+01 : f32
    %12 = vector.broadcast %cst_12 : f32 to vector<16x1xf32>
    %13 = arith.divf %11, %12 : vector<16x1xf32>
    %14 = vector.broadcast %13 : vector<16x1xf32> to vector<16x32xf32>
    %15 = arith.subf %7, %14 : vector<16x32xf32>
    %16 = arith.mulf %15, %15 : vector<16x32xf32>
    %cst_13 = arith.constant dense<0.000000e+00> : vector<16xf32>
    %17 = vector.multi_reduction <add>, %16, %cst_13 [1] : vector<16x32xf32> to vector<16xf32>
    %18 = vector.shape_cast %17 : vector<16xf32> to vector<16x1xf32>
    %cst_14 = arith.constant 3.200000e+01 : f32
    %19 = vector.broadcast %cst_14 : f32 to vector<16x1xf32>
    %20 = arith.divf %18, %19 : vector<16x1xf32>
    %cst_15 = arith.constant 9.99999974E-6 : f32
    %21 = vector.broadcast %cst_15 : f32 to vector<16x1xf32>
    %22 = arith.addf %20, %21 : vector<16x1xf32>
    %23 = math.rsqrt %22 : vector<16x1xf32>
    %24 = vector.broadcast %23 : vector<16x1xf32> to vector<16x32xf32>
    %25 = arith.mulf %15, %24 : vector<16x32xf32>
    %26 = vector.broadcast %8 : vector<1x32xf32> to vector<16x32xf32>
    %27 = arith.mulf %25, %26 : vector<16x32xf32>
    %28 = vector.broadcast %9 : vector<1x32xf32> to vector<16x32xf32>
    %29 = arith.addf %27, %28 : vector<16x32xf32>
    %c0_16 = arith.constant 0 : index
    %c0_17 = arith.constant 0 : index
    %30 = vector.load %arg9[%c0_16, %c0_17] : memref<16x32xf32, #tpu.memory_space<vmem>>, vector<16x32xf32>
    tpu.vector_store %arg9[%c0_16, %c0_17], %29 {strides = array<i32>} : memref<16x32xf32, #tpu.memory_space<vmem>>, vector<16x32xf32>,
    %31 = arith.truncf %29 : vector<16x32xf32> to vector<16x32xbf16>
    %c0_18 = arith.constant 0 : index
    %c0_19 = arith.constant 0 : index
    %32 = vector.load %arg7[%c0_18, %c0_19] : memref<32x32xbf16, #tpu.memory_space<vmem>>, vector<32x32xbf16>
    %cst_20 = arith.constant dense<0.000000e+00> : vector<16x32xf32>
    %33 = tpu.matmul %31, %32, %cst_20 {dimension_numbers = #tpu.dot_dimension_numbers<[1], [0], [0], [1], [0, 0, 1, 1], [], []>} : vector<16x32xbf16>, vector<32x32xbf16>, vector<16x32xf32> -> vector<16x32xf32>
    %c0_21 = arith.constant 0 : index
    %c0_22 = arith.constant 0 : index
    %34 = vector.load %arg8[%c0_21, %c0_22] : memref<1x32xf32, #tpu.memory_space<vmem>>, vector<1x32xf32>
    %35 = vector.broadcast %34 : vector<1x32xf32> to vector<16x32xf32>
    %36 = arith.addf %33, %35 : vector<16x32xf32>
    %37 = arith.truncf %36 : vector<16x32xf32> to vector<16x32xbf16>
    %c0_23 = arith.constant 0 : index
    %c0_24 = arith.constant 0 : index
    %38 = vector.load %arg10[%c0_23, %c0_24] : memref<16x32xbf16, #tpu.memory_space<vmem>>, vector<16x32xbf16>
    tpu.vector_store %arg10[%c0_23, %c0_24], %37 {strides = array<i32>} : memref<16x32xbf16, #tpu.memory_space<vmem>>, vector<16x32xbf16>,
    return
  }
  func.func @transform_0(%arg0: i32) -> (i32, i32) {
    %c0_i32 = arith.constant 0 : i32
    %c0_i32_0 = arith.constant 0 : i32
    return %arg0, %c0_i32 : i32, i32
  }
  func.func @transform_1(%arg0: i32) -> (i32, i32) {
    %c0_i32 = arith.constant 0 : i32
    %c0_i32_0 = arith.constant 0 : i32
    return %arg0, %c0_i32 : i32, i32
  }
  func.func @transform_2(%arg0: i32) -> (i32, i32) {
    %c0_i32 = arith.constant 0 : i32
    %c0_i32_0 = arith.constant 0 : i32
    %c0_i32_1 = arith.constant 0 : i32
    return %c0_i32, %c0_i32_0 : i32, i32
  }
  func.func @transform_3(%arg0: i32) -> (i32, i32) {
    %c0_i32 = arith.constant 0 : i32
    %c0_i32_0 = arith.constant 0 : i32
    %c0_i32_1 = arith.constant 0 : i32
    return %c0_i32, %c0_i32_0 : i32, i32
  }
  func.func @transform_4(%arg0: i32) -> (i32, i32) {
    %c0_i32 = arith.constant 0 : i32
    %c0_i32_0 = arith.constant 0 : i32
    %c0_i32_1 = arith.constant 0 : i32
    return %c0_i32, %c0_i32_0 : i32, i32
  }
  func.func @transform_5(%arg0: i32) -> (i32, i32) {
    %c0_i32 = arith.constant 0 : i32
    %c0_i32_0 = arith.constant 0 : i32
    %c0_i32_1 = arith.constant 0 : i32
    return %c0_i32, %c0_i32_0 : i32, i32
  }
  func.func @transform_6(%arg0: i32) -> (i32, i32) {
    %c0_i32 = arith.constant 0 : i32
    %c0_i32_0 = arith.constant 0 : i32
    %c0_i32_1 = arith.constant 0 : i32
    return %c0_i32, %c0_i32_0 : i32, i32
  }
  func.func @transform_7(%arg0: i32) -> (i32, i32) {
    %c0_i32 = arith.constant 0 : i32
    %c0_i32_0 = arith.constant 0 : i32
    %c0_i32_1 = arith.constant 0 : i32
    return %c0_i32, %c0_i32_0 : i32, i32
  }
  func.func @transform_8(%arg0: i32) -> (i32, i32) {
    %c0_i32 = arith.constant 0 : i32
    %c0_i32_0 = arith.constant 0 : i32
    return %arg0, %c0_i32 : i32, i32
  }
  func.func @transform_9(%arg0: i32) -> (i32, i32) {
    %c0_i32 = arith.constant 0 : i32
    %c0_i32_0 = arith.constant 0 : i32
    return %arg0, %c0_i32 : i32, i32
  }
}

module attributes {stable_mosaic.version = 11 : i64} {
  func.func @_proj_add_ln_kernel(%arg0: i32, %arg1: memref<16x32xbf16, #tpu.memory_space<vmem>>, %arg2: memref<16x32xf32, #tpu.memory_space<vmem>>, %arg3: memref<32x32xbf16, #tpu.memory_space<vmem>>, %arg4: memref<1x32xf32, #tpu.memory_space<vmem>>, %arg5: memref<1x32xf32, #tpu.memory_space<vmem>>, %arg6: memref<1x32xf32, #tpu.memory_space<vmem>>, %arg7: memref<16x32xf32, #tpu.memory_space<vmem>>) attributes {dimension_semantics = [#tpu.dimension_semantics<parallel>], iteration_bounds = array<i64: 1>, scalar_prefetch = 0 : i64, scratch_operands = 0 : i64, tpu.core_type = #tpu.core_type<tc>, window_params = [{transform_indices = @transform_0, window_bounds = array<i64: 16, 32>}, {transform_indices = @transform_1, window_bounds = array<i64: 16, 32>}, {pipeline_mode = #tpu.pipeline_mode<synchronous>, transform_indices = @transform_2, window_bounds = array<i64: 32, 32>}, {pipeline_mode = #tpu.pipeline_mode<synchronous>, transform_indices = @transform_3, window_bounds = array<i64: 1, 32>}, {pipeline_mode = #tpu.pipeline_mode<synchronous>, transform_indices = @transform_4, window_bounds = array<i64: 1, 32>}, {pipeline_mode = #tpu.pipeline_mode<synchronous>, transform_indices = @transform_5, window_bounds = array<i64: 1, 32>}, {transform_indices = @transform_6, window_bounds = array<i64: 16, 32>}]} {
    %c0 = arith.constant 0 : index
    %c0_0 = arith.constant 0 : index
    %0 = vector.load %arg1[%c0, %c0_0] : memref<16x32xbf16, #tpu.memory_space<vmem>>, vector<16x32xbf16>
    %c0_1 = arith.constant 0 : index
    %c0_2 = arith.constant 0 : index
    %1 = vector.load %arg3[%c0_1, %c0_2] : memref<32x32xbf16, #tpu.memory_space<vmem>>, vector<32x32xbf16>
    %cst = arith.constant dense<0.000000e+00> : vector<16x32xf32>
    %2 = tpu.matmul %0, %1, %cst {dimension_numbers = #tpu.dot_dimension_numbers<[1], [0], [0], [1], [0, 0, 1, 1], [], []>} : vector<16x32xbf16>, vector<32x32xbf16>, vector<16x32xf32> -> vector<16x32xf32>
    %c0_3 = arith.constant 0 : index
    %c0_4 = arith.constant 0 : index
    %3 = vector.load %arg4[%c0_3, %c0_4] : memref<1x32xf32, #tpu.memory_space<vmem>>, vector<1x32xf32>
    %4 = vector.broadcast %3 : vector<1x32xf32> to vector<16x32xf32>
    %5 = arith.addf %2, %4 : vector<16x32xf32>
    %c0_5 = arith.constant 0 : index
    %c0_6 = arith.constant 0 : index
    %6 = vector.load %arg2[%c0_5, %c0_6] : memref<16x32xf32, #tpu.memory_space<vmem>>, vector<16x32xf32>
    %7 = arith.addf %6, %5 : vector<16x32xf32>
    %c0_7 = arith.constant 0 : index
    %c0_8 = arith.constant 0 : index
    %8 = vector.load %arg5[%c0_7, %c0_8] : memref<1x32xf32, #tpu.memory_space<vmem>>, vector<1x32xf32>
    %c0_9 = arith.constant 0 : index
    %c0_10 = arith.constant 0 : index
    %9 = vector.load %arg6[%c0_9, %c0_10] : memref<1x32xf32, #tpu.memory_space<vmem>>, vector<1x32xf32>
    %cst_11 = arith.constant dense<0.000000e+00> : vector<16xf32>
    %10 = vector.multi_reduction <add>, %7, %cst_11 [1] : vector<16x32xf32> to vector<16xf32>
    %11 = vector.shape_cast %10 : vector<16xf32> to vector<16x1xf32>
    %cst_12 = arith.constant 3.200000e+01 : f32
    %12 = vector.broadcast %cst_12 : f32 to vector<16x1xf32>
    %13 = arith.divf %11, %12 : vector<16x1xf32>
    %14 = vector.broadcast %13 : vector<16x1xf32> to vector<16x32xf32>
    %15 = arith.subf %7, %14 : vector<16x32xf32>
    %16 = arith.mulf %15, %15 : vector<16x32xf32>
    %cst_13 = arith.constant dense<0.000000e+00> : vector<16xf32>
    %17 = vector.multi_reduction <add>, %16, %cst_13 [1] : vector<16x32xf32> to vector<16xf32>
    %18 = vector.shape_cast %17 : vector<16xf32> to vector<16x1xf32>
    %cst_14 = arith.constant 3.200000e+01 : f32
    %19 = vector.broadcast %cst_14 : f32 to vector<16x1xf32>
    %20 = arith.divf %18, %19 : vector<16x1xf32>
    %cst_15 = arith.constant 9.99999974E-6 : f32
    %21 = vector.broadcast %cst_15 : f32 to vector<16x1xf32>
    %22 = arith.addf %20, %21 : vector<16x1xf32>
    %23 = math.rsqrt %22 : vector<16x1xf32>
    %24 = vector.broadcast %23 : vector<16x1xf32> to vector<16x32xf32>
    %25 = arith.mulf %15, %24 : vector<16x32xf32>
    %26 = vector.broadcast %8 : vector<1x32xf32> to vector<16x32xf32>
    %27 = arith.mulf %25, %26 : vector<16x32xf32>
    %28 = vector.broadcast %9 : vector<1x32xf32> to vector<16x32xf32>
    %29 = arith.addf %27, %28 : vector<16x32xf32>
    %c0_16 = arith.constant 0 : index
    %c0_17 = arith.constant 0 : index
    %30 = vector.load %arg7[%c0_16, %c0_17] : memref<16x32xf32, #tpu.memory_space<vmem>>, vector<16x32xf32>
    tpu.vector_store %arg7[%c0_16, %c0_17], %29 {strides = array<i32>} : memref<16x32xf32, #tpu.memory_space<vmem>>, vector<16x32xf32>,
    return
  }
  func.func @transform_0(%arg0: i32) -> (i32, i32) {
    %c0_i32 = arith.constant 0 : i32
    %c0_i32_0 = arith.constant 0 : i32
    return %arg0, %c0_i32 : i32, i32
  }
  func.func @transform_1(%arg0: i32) -> (i32, i32) {
    %c0_i32 = arith.constant 0 : i32
    %c0_i32_0 = arith.constant 0 : i32
    return %arg0, %c0_i32 : i32, i32
  }
  func.func @transform_2(%arg0: i32) -> (i32, i32) {
    %c0_i32 = arith.constant 0 : i32
    %c0_i32_0 = arith.constant 0 : i32
    %c0_i32_1 = arith.constant 0 : i32
    return %c0_i32, %c0_i32_0 : i32, i32
  }
  func.func @transform_3(%arg0: i32) -> (i32, i32) {
    %c0_i32 = arith.constant 0 : i32
    %c0_i32_0 = arith.constant 0 : i32
    %c0_i32_1 = arith.constant 0 : i32
    return %c0_i32, %c0_i32_0 : i32, i32
  }
  func.func @transform_4(%arg0: i32) -> (i32, i32) {
    %c0_i32 = arith.constant 0 : i32
    %c0_i32_0 = arith.constant 0 : i32
    %c0_i32_1 = arith.constant 0 : i32
    return %c0_i32, %c0_i32_0 : i32, i32
  }
  func.func @transform_5(%arg0: i32) -> (i32, i32) {
    %c0_i32 = arith.constant 0 : i32
    %c0_i32_0 = arith.constant 0 : i32
    %c0_i32_1 = arith.constant 0 : i32
    return %c0_i32, %c0_i32_0 : i32, i32
  }
  func.func @transform_6(%arg0: i32) -> (i32, i32) {
    %c0_i32 = arith.constant 0 : i32
    %c0_i32_0 = arith.constant 0 : i32
    return %arg0, %c0_i32 : i32, i32
  }
}

module attributes {stable_mosaic.version = 11 : i64} {
  func.func @_attn_kernel(%arg0: i32, %arg1: i32, %arg2: memref<1x8x32xbf16, #tpu.memory_space<vmem>>, %arg3: memref<1x8x64xbf16, #tpu.memory_space<vmem>>, %arg4: memref<1x8x32xbf16, #tpu.memory_space<vmem>>) attributes {dimension_semantics = [#tpu.dimension_semantics<parallel>, #tpu.dimension_semantics<parallel>], iteration_bounds = array<i64: 2, 1>, scalar_prefetch = 0 : i64, scratch_operands = 0 : i64, tpu.core_type = #tpu.core_type<tc>, window_params = [{transform_indices = @transform_0, window_bounds = array<i64: 1, 8, 32>}, {transform_indices = @transform_1, window_bounds = array<i64: 1, 8, 64>}, {transform_indices = @transform_2, window_bounds = array<i64: 1, 8, 32>}]} {
    %c0 = arith.constant 0 : index
    %c0_0 = arith.constant 0 : index
    %c0_1 = arith.constant 0 : index
    %0 = vector.load %arg2[%c0, %c0_0, %c0_1] : memref<1x8x32xbf16, #tpu.memory_space<vmem>>, vector<1x8x32xbf16>
    %1 = vector.shape_cast %0 : vector<1x8x32xbf16> to vector<8x32xbf16>
    %c0_2 = arith.constant 0 : index
    %c0_3 = arith.constant 0 : index
    %c0_4 = arith.constant 0 : index
    %2 = vector.load %arg3[%c0_2, %c0_3, %c0_4] : memref<1x8x64xbf16, #tpu.memory_space<vmem>>, vector<1x8x64xbf16>
    %3 = vector.shape_cast %2 : vector<1x8x64xbf16> to vector<8x64xbf16>
    %4 = vector.extract_strided_slice %1 {offsets = [0, 0], sizes = [8, 8], strides = [1, 1]} : vector<8x32xbf16> to vector<8x8xbf16>
    %5 = vector.extract_strided_slice %3 {offsets = [0, 0], sizes = [8, 8], strides = [1, 1]} : vector<8x64xbf16> to vector<8x8xbf16>
    %6 = vector.extract_strided_slice %3 {offsets = [0, 32], sizes = [8, 8], strides = [1, 1]} : vector<8x64xbf16> to vector<8x8xbf16>
    %cst = arith.constant dense<0.000000e+00> : vector<8x8xf32>
    %7 = tpu.matmul %4, %5, %cst {dimension_numbers = #tpu.dot_dimension_numbers<[1], [1], [0], [0], [0, 0, 1, 0], [], []>} : vector<8x8xbf16>, vector<8x8xbf16>, vector<8x8xf32> -> vector<8x8xf32>
    %cst_5 = arith.constant dense<0xFF800000> : vector<8xf32>
    %8 = vector.multi_reduction <maximumf>, %7, %cst_5 [1] : vector<8x8xf32> to vector<8xf32>
    %9 = vector.shape_cast %8 : vector<8xf32> to vector<8x1xf32>
    %10 = vector.broadcast %9 : vector<8x1xf32> to vector<8x8xf32>
    %11 = arith.subf %7, %10 : vector<8x8xf32>
    %12 = math.exp %11 : vector<8x8xf32>
    %cst_6 = arith.constant dense<0.000000e+00> : vector<8xf32>
    %13 = vector.multi_reduction <add>, %12, %cst_6 [1] : vector<8x8xf32> to vector<8xf32>
    %14 = vector.shape_cast %13 : vector<8xf32> to vector<8x1xf32>
    %15 = tpu.reciprocal %14 {approx = true} : vector<8x1xf32> -> vector<8x1xf32>
    %16 = vector.broadcast %15 : vector<8x1xf32> to vector<8x8xf32>
    %17 = arith.mulf %12, %16 : vector<8x8xf32>
    %18 = arith.truncf %17 : vector<8x8xf32> to vector<8x8xbf16>
    %cst_7 = arith.constant dense<0.000000e+00> : vector<8x8xf32>
    %19 = tpu.matmul %18, %6, %cst_7 {dimension_numbers = #tpu.dot_dimension_numbers<[1], [0], [0], [1], [0, 0, 1, 1], [], []>} : vector<8x8xbf16>, vector<8x8xbf16>, vector<8x8xf32> -> vector<8x8xf32>
    %20 = arith.truncf %19 : vector<8x8xf32> to vector<8x8xbf16>
    %c0_8 = arith.constant 0 : index
    %c0_9 = arith.constant 0 : index
    %c0_10 = arith.constant 0 : index
    %21 = vector.load %arg4[%c0_8, %c0_9, %c0_10] : memref<1x8x32xbf16, #tpu.memory_space<vmem>>, vector<1x8x8xbf16>
    %22 = vector.shape_cast %21 : vector<1x8x8xbf16> to vector<8x8xbf16>
    %23 = vector.shape_cast %20 : vector<8x8xbf16> to vector<1x8x8xbf16>
    tpu.vector_store %arg4[%c0_8, %c0_9, %c0_10], %23 {strides = array<i32>} : memref<1x8x32xbf16, #tpu.memory_space<vmem>>, vector<1x8x8xbf16>,
    %24 = vector.extract_strided_slice %1 {offsets = [0, 8], sizes = [8, 8], strides = [1, 1]} : vector<8x32xbf16> to vector<8x8xbf16>
    %25 = vector.extract_strided_slice %3 {offsets = [0, 8], sizes = [8, 8], strides = [1, 1]} : vector<8x64xbf16> to vector<8x8xbf16>
    %26 = vector.extract_strided_slice %3 {offsets = [0, 40], sizes = [8, 8], strides = [1, 1]} : vector<8x64xbf16> to vector<8x8xbf16>
    %cst_11 = arith.constant dense<0.000000e+00> : vector<8x8xf32>
    %27 = tpu.matmul %24, %25, %cst_11 {dimension_numbers = #tpu.dot_dimension_numbers<[1], [1], [0], [0], [0, 0, 1, 0], [], []>} : vector<8x8xbf16>, vector<8x8xbf16>, vector<8x8xf32> -> vector<8x8xf32>
    %cst_12 = arith.constant dense<0xFF800000> : vector<8xf32>
    %28 = vector.multi_reduction <maximumf>, %27, %cst_12 [1] : vector<8x8xf32> to vector<8xf32>
    %29 = vector.shape_cast %28 : vector<8xf32> to vector<8x1xf32>
    %30 = vector.broadcast %29 : vector<8x1xf32> to vector<8x8xf32>
    %31 = arith.subf %27, %30 : vector<8x8xf32>
    %32 = math.exp %31 : vector<8x8xf32>
    %cst_13 = arith.constant dense<0.000000e+00> : vector<8xf32>
    %33 = vector.multi_reduction <add>, %32, %cst_13 [1] : vector<8x8xf32> to vector<8xf32>
    %34 = vector.shape_cast %33 : vector<8xf32> to vector<8x1xf32>
    %35 = tpu.reciprocal %34 {approx = true} : vector<8x1xf32> -> vector<8x1xf32>
    %36 = vector.broadcast %35 : vector<8x1xf32> to vector<8x8xf32>
    %37 = arith.mulf %32, %36 : vector<8x8xf32>
    %38 = arith.truncf %37 : vector<8x8xf32> to vector<8x8xbf16>
    %cst_14 = arith.constant dense<0.000000e+00> : vector<8x8xf32>
    %39 = tpu.matmul %38, %26, %cst_14 {dimension_numbers = #tpu.dot_dimension_numbers<[1], [0], [0], [1], [0, 0, 1, 1], [], []>} : vector<8x8xbf16>, vector<8x8xbf16>, vector<8x8xf32> -> vector<8x8xf32>
    %40 = arith.truncf %39 : vector<8x8xf32> to vector<8x8xbf16>
    %c0_15 = arith.constant 0 : index
    %c0_16 = arith.constant 0 : index
    %c8 = arith.constant 8 : index
    %41 = vector.load %arg4[%c0_15, %c0_16, %c8] : memref<1x8x32xbf16, #tpu.memory_space<vmem>>, vector<1x8x8xbf16>
    %42 = vector.shape_cast %41 : vector<1x8x8xbf16> to vector<8x8xbf16>
    %43 = vector.shape_cast %40 : vector<8x8xbf16> to vector<1x8x8xbf16>
    tpu.vector_store %arg4[%c0_15, %c0_16, %c8], %43 {strides = array<i32>} : memref<1x8x32xbf16, #tpu.memory_space<vmem>>, vector<1x8x8xbf16>,
    %44 = vector.extract_strided_slice %1 {offsets = [0, 16], sizes = [8, 8], strides = [1, 1]} : vector<8x32xbf16> to vector<8x8xbf16>
    %45 = vector.extract_strided_slice %3 {offsets = [0, 16], sizes = [8, 8], strides = [1, 1]} : vector<8x64xbf16> to vector<8x8xbf16>
    %46 = vector.extract_strided_slice %3 {offsets = [0, 48], sizes = [8, 8], strides = [1, 1]} : vector<8x64xbf16> to vector<8x8xbf16>
    %cst_17 = arith.constant dense<0.000000e+00> : vector<8x8xf32>
    %47 = tpu.matmul %44, %45, %cst_17 {dimension_numbers = #tpu.dot_dimension_numbers<[1], [1], [0], [0], [0, 0, 1, 0], [], []>} : vector<8x8xbf16>, vector<8x8xbf16>, vector<8x8xf32> -> vector<8x8xf32>
    %cst_18 = arith.constant dense<0xFF800000> : vector<8xf32>
    %48 = vector.multi_reduction <maximumf>, %47, %cst_18 [1] : vector<8x8xf32> to vector<8xf32>
    %49 = vector.shape_cast %48 : vector<8xf32> to vector<8x1xf32>
    %50 = vector.broadcast %49 : vector<8x1xf32> to vector<8x8xf32>
    %51 = arith.subf %47, %50 : vector<8x8xf32>
    %52 = math.exp %51 : vector<8x8xf32>
    %cst_19 = arith.constant dense<0.000000e+00> : vector<8xf32>
    %53 = vector.multi_reduction <add>, %52, %cst_19 [1] : vector<8x8xf32> to vector<8xf32>
    %54 = vector.shape_cast %53 : vector<8xf32> to vector<8x1xf32>
    %55 = tpu.reciprocal %54 {approx = true} : vector<8x1xf32> -> vector<8x1xf32>
    %56 = vector.broadcast %55 : vector<8x1xf32> to vector<8x8xf32>
    %57 = arith.mulf %52, %56 : vector<8x8xf32>
    %58 = arith.truncf %57 : vector<8x8xf32> to vector<8x8xbf16>
    %cst_20 = arith.constant dense<0.000000e+00> : vector<8x8xf32>
    %59 = tpu.matmul %58, %46, %cst_20 {dimension_numbers = #tpu.dot_dimension_numbers<[1], [0], [0], [1], [0, 0, 1, 1], [], []>} : vector<8x8xbf16>, vector<8x8xbf16>, vector<8x8xf32> -> vector<8x8xf32>
    %60 = arith.truncf %59 : vector<8x8xf32> to vector<8x8xbf16>
    %c0_21 = arith.constant 0 : index
    %c0_22 = arith.constant 0 : index
    %c16 = arith.constant 16 : index
    %61 = vector.load %arg4[%c0_21, %c0_22, %c16] : memref<1x8x32xbf16, #tpu.memory_space<vmem>>, vector<1x8x8xbf16>
    %62 = vector.shape_cast %61 : vector<1x8x8xbf16> to vector<8x8xbf16>
    %63 = vector.shape_cast %60 : vector<8x8xbf16> to vector<1x8x8xbf16>
    tpu.vector_store %arg4[%c0_21, %c0_22, %c16], %63 {strides = array<i32>} : memref<1x8x32xbf16, #tpu.memory_space<vmem>>, vector<1x8x8xbf16>,
    %64 = vector.extract_strided_slice %1 {offsets = [0, 24], sizes = [8, 8], strides = [1, 1]} : vector<8x32xbf16> to vector<8x8xbf16>
    %65 = vector.extract_strided_slice %3 {offsets = [0, 24], sizes = [8, 8], strides = [1, 1]} : vector<8x64xbf16> to vector<8x8xbf16>
    %66 = vector.extract_strided_slice %3 {offsets = [0, 56], sizes = [8, 8], strides = [1, 1]} : vector<8x64xbf16> to vector<8x8xbf16>
    %cst_23 = arith.constant dense<0.000000e+00> : vector<8x8xf32>
    %67 = tpu.matmul %64, %65, %cst_23 {dimension_numbers = #tpu.dot_dimension_numbers<[1], [1], [0], [0], [0, 0, 1, 0], [], []>} : vector<8x8xbf16>, vector<8x8xbf16>, vector<8x8xf32> -> vector<8x8xf32>
    %cst_24 = arith.constant dense<0xFF800000> : vector<8xf32>
    %68 = vector.multi_reduction <maximumf>, %67, %cst_24 [1] : vector<8x8xf32> to vector<8xf32>
    %69 = vector.shape_cast %68 : vector<8xf32> to vector<8x1xf32>
    %70 = vector.broadcast %69 : vector<8x1xf32> to vector<8x8xf32>
    %71 = arith.subf %67, %70 : vector<8x8xf32>
    %72 = math.exp %71 : vector<8x8xf32>
    %cst_25 = arith.constant dense<0.000000e+00> : vector<8xf32>
    %73 = vector.multi_reduction <add>, %72, %cst_25 [1] : vector<8x8xf32> to vector<8xf32>
    %74 = vector.shape_cast %73 : vector<8xf32> to vector<8x1xf32>
    %75 = tpu.reciprocal %74 {approx = true} : vector<8x1xf32> -> vector<8x1xf32>
    %76 = vector.broadcast %75 : vector<8x1xf32> to vector<8x8xf32>
    %77 = arith.mulf %72, %76 : vector<8x8xf32>
    %78 = arith.truncf %77 : vector<8x8xf32> to vector<8x8xbf16>
    %cst_26 = arith.constant dense<0.000000e+00> : vector<8x8xf32>
    %79 = tpu.matmul %78, %66, %cst_26 {dimension_numbers = #tpu.dot_dimension_numbers<[1], [0], [0], [1], [0, 0, 1, 1], [], []>} : vector<8x8xbf16>, vector<8x8xbf16>, vector<8x8xf32> -> vector<8x8xf32>
    %80 = arith.truncf %79 : vector<8x8xf32> to vector<8x8xbf16>
    %c0_27 = arith.constant 0 : index
    %c0_28 = arith.constant 0 : index
    %c24 = arith.constant 24 : index
    %81 = vector.load %arg4[%c0_27, %c0_28, %c24] : memref<1x8x32xbf16, #tpu.memory_space<vmem>>, vector<1x8x8xbf16>
    %82 = vector.shape_cast %81 : vector<1x8x8xbf16> to vector<8x8xbf16>
    %83 = vector.shape_cast %80 : vector<8x8xbf16> to vector<1x8x8xbf16>
    tpu.vector_store %arg4[%c0_27, %c0_28, %c24], %83 {strides = array<i32>} : memref<1x8x32xbf16, #tpu.memory_space<vmem>>, vector<1x8x8xbf16>,
    return
  }
  func.func @transform_0(%arg0: i32, %arg1: i32) -> (i32, i32, i32) {
    %c0_i32 = arith.constant 0 : i32
    %c0_i32_0 = arith.constant 0 : i32
    return %arg0, %arg1, %c0_i32 : i32, i32, i32
  }
  func.func @transform_1(%arg0: i32, %arg1: i32) -> (i32, i32, i32) {
    %c0_i32 = arith.constant 0 : i32
    %c0_i32_0 = arith.constant 0 : i32
    %c0_i32_1 = arith.constant 0 : i32
    return %arg0, %c0_i32, %c0_i32_0 : i32, i32, i32
  }
  func.func @transform_2(%arg0: i32, %arg1: i32) -> (i32, i32, i32) {
    %c0_i32 = arith.constant 0 : i32
    %c0_i32_0 = arith.constant 0 : i32
    return %arg0, %arg1, %c0_i32 : i32, i32, i32
  }
}

module attributes {stable_mosaic.version = 11 : i64} {
  func.func @_ffn_add_ln_kernel(%arg0: i32, %arg1: i32, %arg2: memref<16x32xf32, #tpu.memory_space<vmem>>, %arg3: memref<32x64xbf16, #tpu.memory_space<vmem>>, %arg4: memref<1x64xf32, #tpu.memory_space<vmem>>, %arg5: memref<64x32xbf16, #tpu.memory_space<vmem>>, %arg6: memref<1x32xf32, #tpu.memory_space<vmem>>, %arg7: memref<1x32xf32, #tpu.memory_space<vmem>>, %arg8: memref<1x32xf32, #tpu.memory_space<vmem>>, %arg9: memref<16x32xf32, #tpu.memory_space<vmem>>, %arg10: memref<16x32xf32, #tpu.memory_space<vmem>>) attributes {dimension_semantics = [#tpu.dimension_semantics<parallel>, #tpu.dimension_semantics<arbitrary>], iteration_bounds = array<i64: 1, 1>, scalar_prefetch = 0 : i64, scratch_operands = 1 : i64, tpu.core_type = #tpu.core_type<tc>, window_params = [{transform_indices = @transform_0, window_bounds = array<i64: 16, 32>}, {transform_indices = @transform_1, window_bounds = array<i64: 32, 64>}, {transform_indices = @transform_2, window_bounds = array<i64: 1, 64>}, {transform_indices = @transform_3, window_bounds = array<i64: 64, 32>}, {pipeline_mode = #tpu.pipeline_mode<synchronous>, transform_indices = @transform_4, window_bounds = array<i64: 1, 32>}, {pipeline_mode = #tpu.pipeline_mode<synchronous>, transform_indices = @transform_5, window_bounds = array<i64: 1, 32>}, {pipeline_mode = #tpu.pipeline_mode<synchronous>, transform_indices = @transform_6, window_bounds = array<i64: 1, 32>}, {transform_indices = @transform_7, window_bounds = array<i64: 16, 32>}]} {
    %c0 = arith.constant 0 : index
    %c0_0 = arith.constant 0 : index
    %0 = vector.load %arg2[%c0, %c0_0] : memref<16x32xf32, #tpu.memory_space<vmem>>, vector<16x32xf32>
    %c0_i32 = arith.constant 0 : i32
    %1 = arith.cmpi eq, %arg1, %c0_i32 : i32
    %2 = arith.extui %1 : i1 to i32
    %c0_i32_1 = arith.constant 0 : i32
    %3 = arith.cmpi ne, %2, %c0_i32_1 : i32
    scf.if %3 {
      %cst_16 = arith.constant 0.000000e+00 : f32
      %21 = vector.broadcast %cst_16 : f32 to vector<16x32xf32>
      %c0_17 = arith.constant 0 : index
      %c0_18 = arith.constant 0 : index
      %22 = vector.load %arg10[%c0_17, %c0_18] : memref<16x32xf32, #tpu.memory_space<vmem>>, vector<16x32xf32>
      tpu.vector_store %arg10[%c0_17, %c0_18], %21 {strides = array<i32>} : memref<16x32xf32, #tpu.memory_space<vmem>>, vector<16x32xf32>,
    } else {
    }
    %4 = arith.truncf %0 : vector<16x32xf32> to vector<16x32xbf16>
    %c0_2 = arith.constant 0 : index
    %c0_3 = arith.constant 0 : index
    %5 = vector.load %arg3[%c0_2, %c0_3] : memref<32x64xbf16, #tpu.memory_space<vmem>>, vector<32x64xbf16>
    %cst = arith.constant dense<0.000000e+00> : vector<16x64xf32>
    %6 = tpu.matmul %4, %5, %cst {dimension_numbers = #tpu.dot_dimension_numbers<[1], [0], [0], [1], [0, 0, 1, 1], [], []>} : vector<16x32xbf16>, vector<32x64xbf16>, vector<16x64xf32> -> vector<16x64xf32>
    %c0_4 = arith.constant 0 : index
    %c0_5 = arith.constant 0 : index
    %7 = vector.load %arg4[%c0_4, %c0_5] : memref<1x64xf32, #tpu.memory_space<vmem>>, vector<1x64xf32>
    %8 = vector.broadcast %7 : vector<1x64xf32> to vector<16x64xf32>
    %9 = arith.addf %6, %8 : vector<16x64xf32>
    %cst_6 = arith.constant 0.000000e+00 : f32
    %10 = vector.broadcast %cst_6 : f32 to vector<16x64xf32>
    %11 = arith.maximumf %9, %10 : vector<16x64xf32>
    %c0_7 = arith.constant 0 : index
    %c0_8 = arith.constant 0 : index
    %12 = vector.load %arg10[%c0_7, %c0_8] : memref<16x32xf32, #tpu.memory_space<vmem>>, vector<16x32xf32>
    %13 = arith.truncf %11 : vector<16x64xf32> to vector<16x64xbf16>
    %c0_9 = arith.constant 0 : index
    %c0_10 = arith.constant 0 : index
    %14 = vector.load %arg5[%c0_9, %c0_10] : memref<64x32xbf16, #tpu.memory_space<vmem>>, vector<64x32xbf16>
    %cst_11 = arith.constant dense<0.000000e+00> : vector<16x32xf32>
    %15 = tpu.matmul %13, %14, %cst_11 {dimension_numbers = #tpu.dot_dimension_numbers<[1], [0], [0], [1], [0, 0, 1, 1], [], []>} : vector<16x64xbf16>, vector<64x32xbf16>, vector<16x32xf32> -> vector<16x32xf32>
    %16 = arith.addf %12, %15 : vector<16x32xf32>
    %c0_12 = arith.constant 0 : index
    %c0_13 = arith.constant 0 : index
    %17 = vector.load %arg10[%c0_12, %c0_13] : memref<16x32xf32, #tpu.memory_space<vmem>>, vector<16x32xf32>
    tpu.vector_store %arg10[%c0_12, %c0_13], %16 {strides = array<i32>} : memref<16x32xf32, #tpu.memory_space<vmem>>, vector<16x32xf32>,
    %c0_i32_14 = arith.constant 0 : i32
    %18 = arith.cmpi eq, %arg1, %c0_i32_14 : i32
    %19 = arith.extui %18 : i1 to i32
    %c0_i32_15 = arith.constant 0 : i32
    %20 = arith.cmpi ne, %19, %c0_i32_15 : i32
    scf.if %20 {
      %c0_16 = arith.constant 0 : index
      %c0_17 = arith.constant 0 : index
      %21 = vector.load %arg10[%c0_16, %c0_17] : memref<16x32xf32, #tpu.memory_space<vmem>>, vector<16x32xf32>
      %c0_18 = arith.constant 0 : index
      %c0_19 = arith.constant 0 : index
      %22 = vector.load %arg6[%c0_18, %c0_19] : memref<1x32xf32, #tpu.memory_space<vmem>>, vector<1x32xf32>
      %23 = vector.broadcast %22 : vector<1x32xf32> to vector<16x32xf32>
      %24 = arith.addf %21, %23 : vector<16x32xf32>
      %25 = arith.addf %0, %24 : vector<16x32xf32>
      %c0_20 = arith.constant 0 : index
      %c0_21 = arith.constant 0 : index
      %26 = vector.load %arg7[%c0_20, %c0_21] : memref<1x32xf32, #tpu.memory_space<vmem>>, vector<1x32xf32>
      %c0_22 = arith.constant 0 : index
      %c0_23 = arith.constant 0 : index
      %27 = vector.load %arg8[%c0_22, %c0_23] : memref<1x32xf32, #tpu.memory_space<vmem>>, vector<1x32xf32>
      %cst_24 = arith.constant dense<0.000000e+00> : vector<16xf32>
      %28 = vector.multi_reduction <add>, %25, %cst_24 [1] : vector<16x32xf32> to vector<16xf32>
      %29 = vector.shape_cast %28 : vector<16xf32> to vector<16x1xf32>
      %cst_25 = arith.constant 3.200000e+01 : f32
      %30 = vector.broadcast %cst_25 : f32 to vector<16x1xf32>
      %31 = arith.divf %29, %30 : vector<16x1xf32>
      %32 = vector.broadcast %31 : vector<16x1xf32> to vector<16x32xf32>
      %33 = arith.subf %25, %32 : vector<16x32xf32>
      %34 = arith.mulf %33, %33 : vector<16x32xf32>
      %cst_26 = arith.constant dense<0.000000e+00> : vector<16xf32>
      %35 = vector.multi_reduction <add>, %34, %cst_26 [1] : vector<16x32xf32> to vector<16xf32>
      %36 = vector.shape_cast %35 : vector<16xf32> to vector<16x1xf32>
      %cst_27 = arith.constant 3.200000e+01 : f32
      %37 = vector.broadcast %cst_27 : f32 to vector<16x1xf32>
      %38 = arith.divf %36, %37 : vector<16x1xf32>
      %cst_28 = arith.constant 9.99999974E-6 : f32
      %39 = vector.broadcast %cst_28 : f32 to vector<16x1xf32>
      %40 = arith.addf %38, %39 : vector<16x1xf32>
      %41 = math.rsqrt %40 : vector<16x1xf32>
      %42 = vector.broadcast %41 : vector<16x1xf32> to vector<16x32xf32>
      %43 = arith.mulf %33, %42 : vector<16x32xf32>
      %44 = vector.broadcast %26 : vector<1x32xf32> to vector<16x32xf32>
      %45 = arith.mulf %43, %44 : vector<16x32xf32>
      %46 = vector.broadcast %27 : vector<1x32xf32> to vector<16x32xf32>
      %47 = arith.addf %45, %46 : vector<16x32xf32>
      %c0_29 = arith.constant 0 : index
      %c0_30 = arith.constant 0 : index
      %48 = vector.load %arg9[%c0_29, %c0_30] : memref<16x32xf32, #tpu.memory_space<vmem>>, vector<16x32xf32>
      tpu.vector_store %arg9[%c0_29, %c0_30], %47 {strides = array<i32>} : memref<16x32xf32, #tpu.memory_space<vmem>>, vector<16x32xf32>,
    } else {
    }
    return
  }
  func.func @transform_0(%arg0: i32, %arg1: i32) -> (i32, i32) {
    %c0_i32 = arith.constant 0 : i32
    %c0_i32_0 = arith.constant 0 : i32
    return %arg0, %c0_i32 : i32, i32
  }
  func.func @transform_1(%arg0: i32, %arg1: i32) -> (i32, i32) {
    %c0_i32 = arith.constant 0 : i32
    %c0_i32_0 = arith.constant 0 : i32
    return %c0_i32, %arg1 : i32, i32
  }
  func.func @transform_2(%arg0: i32, %arg1: i32) -> (i32, i32) {
    %c0_i32 = arith.constant 0 : i32
    %c0_i32_0 = arith.constant 0 : i32
    return %c0_i32, %arg1 : i32, i32
  }
  func.func @transform_3(%arg0: i32, %arg1: i32) -> (i32, i32) {
    %c0_i32 = arith.constant 0 : i32
    %c0_i32_0 = arith.constant 0 : i32
    return %arg1, %c0_i32 : i32, i32
  }
  func.func @transform_4(%arg0: i32, %arg1: i32) -> (i32, i32) {
    %c0_i32 = arith.constant 0 : i32
    %c0_i32_0 = arith.constant 0 : i32
    %c0_i32_1 = arith.constant 0 : i32
    return %c0_i32, %c0_i32_0 : i32, i32
  }
  func.func @transform_5(%arg0: i32, %arg1: i32) -> (i32, i32) {
    %c0_i32 = arith.constant 0 : i32
    %c0_i32_0 = arith.constant 0 : i32
    %c0_i32_1 = arith.constant 0 : i32
    return %c0_i32, %c0_i32_0 : i32, i32
  }
  func.func @transform_6(%arg0: i32, %arg1: i32) -> (i32, i32) {
    %c0_i32 = arith.constant 0 : i32
    %c0_i32_0 = arith.constant 0 : i32
    %c0_i32_1 = arith.constant 0 : i32
    return %c0_i32, %c0_i32_0 : i32, i32
  }
  func.func @transform_7(%arg0: i32, %arg1: i32) -> (i32, i32) {
    %c0_i32 = arith.constant 0 : i32
    %c0_i32_0 = arith.constant 0 : i32
    return %arg0, %c0_i32 : i32, i32
  }
}

</mosaic_0001>

<bundles_post_ra>
// kernel: decoder_layer.10
= control target key start
LH: loop header
LB: loop body
LE: loop exit
PB: predicated region body
PF: predicated region fallthrough
CT: control target
= control target key end

     0   :  { %8 = vsyncpa [#allocation3], 0  ;;  %s247_s0 = inlined_call_operand.hbm [shape: f32[16,32], index: 0, kind: input, shape index: {}]   ;;  %s248_s1 = inlined_call_operand.hbm [shape: bf16[32,64], index: 1, kind: input, shape index: {}]   ;;  %s249_s2 = inlined_call_operand.vmem [shape: f32[1,64], index: 2, kind: input, shape index: {}]   ;;  %s250_s3 = inlined_call_operand.vmem [shape: bf16[16,64], index: 3, kind: output, shape index: {}]  }
   0x1   :  { %9 = vsyncpa [#allocation5], 0  ;;  %s204_s12 = smov [#allocation2]  }
   0x2   :  { %s15_s13 = sshll.u32 %s204_s12, 4  ;;  %s16_s13 = int_to_ptr.vmem [resolvable:$true] %s15_s13 }
   0x3   :  { %s168_s14 = scalar_lea.vmem %s16_s13, 256  ;;  %p173_p1 = scmp.lt.s32.totalorder %s16_s13, %s16_s13 }
   0x4   :  { %p169_p0 = scmp.ne.s32.totalorder %s16_s13, %s168_s14  ;;  %p174_p2 = scmp.lt.s32.totalorder %s168_s14, %s168_s14 }
   0x6   :  { %p175_p3 = por %p174_p2, %p173_p1 }
   0x8   :  { %p176_p4 = pnand %p175_p3, %p169_p0 }
   0xa   :  { %179 = shalt.err (!%p176_p4)
}
   0xb   :  { %s205_s15 = smov 128   ;;  %s206_s16 = smov 8  }
   0xc   :  { %21 = dma.hbm_to_vmem [thread:$0]  %s247_s0, 256, %s16_s13, [#allocation3], %s205_s15, %s205_s15, %s206_s16  }
   0xd   :  { %s207_s19 = smov [#allocation4]  }
   0xe   :  { %s27_s20 = sshll.u32 %s207_s19, 4  ;;  %s28_s20 = int_to_ptr.vmem [resolvable:$true] %s27_s20 }
   0xf   :  { %s188_s21 = scalar_lea.vmem %s28_s20, 256  ;;  %p193_p6 = scmp.lt.s32.totalorder %s28_s20, %s28_s20 }
  0x10   :  { %p189_p5 = scmp.ne.s32.totalorder %s28_s20, %s188_s21  ;;  %p194_p7 = scmp.lt.s32.totalorder %s188_s21, %s188_s21 }
  0x12   :  { %p195_p8 = por %p194_p7, %p193_p6 }
  0x14   :  { %p196_p9 = pnand %p195_p8, %p189_p5 }
  0x16   :  { %199 = shalt.err (!%p196_p9)
}
  0x17   :  { %s208_s22 = smov 64   ;;  %s209_s23 = smov 4  }
  0x18   :  { %33 = dma.hbm_to_vmem [thread:$0]  %s248_s1, 256, %s28_s20, [#allocation5], %s208_s22, %s208_s22, %s209_s23  }
  0x19   :  { %200 = dma.done.wait [#allocation3], 256  }
  0x1a   :  { %201 = vsyncadd [#allocation3], 4294967040 }
  0x1b   :  { %202 = dma.done.wait [#allocation5], 256  }
  0x1c   :  { %203 = vsyncadd [#allocation5], 4294967040  ;;  %v210_v0 = vmov 0.0   ;;  %vm211_vm0 = vmmov 0   ;;  %v158_v1 = vld [vmem:[#allocation4 + $0x8] sm:$0xff]   ;;  %v159_v2 = vld [vmem:[#allocation4] sm:$0xff]  }
  0x1d   :  { %142 = vmatprep.subr.bf16.mxu0 %v210_v0  ;;  %146 = vmatprep.mubr.msk.bf16.mxu0 %vm211_vm0, %v210_v0  ;;  %v43_v3 = vld [vmem:[#allocation2] sm:$0xff]  ;;  %v44_v4 = vld [vmem:[#allocation2 + $0x8] sm:$0xff]  ;;  %vm69_vm1 = vcmask 261120   ;;  %vm122_vm2 = vcmask 519168  }
  0x1e   :  { %143 = vmatpush3.bf16.msra.mxu0 %v158_v1  ;;  %v45_v5 = vpack.c.bf16 %v44_v4, %v43_v3  ;;  %v131_v6 = vld [vmem:[%s249_s2] ss:$0 sm:$0xff] }
  0x1f   :  { %144 = vmatprep.subr.bf16.mxu0 %v210_v0 }
  0x22   :  { %145 = vmatpush3.bf16.msra.mxu0 %v159_v2 }
  0x25   :  { %147 = vmatmul.mubr.msk.bf16.vlgmr.msra.gmra.mxu0 %vm69_vm1, %v45_v5 }
  0xe5   :  { %v107_v7 = vpop.f32.mrf.mxu0 }
  0xe6   :  { %v108_v8 = vadd.f32 %v131_v6, %v107_v7 }
  0xe7   :  { %v148_v9 = vpop.f32.mrf.mxu0 }
  0xe8   :  { %v137_v10 = vpack.c.bf16 %v108_v8, %v108_v8 }
  0xe9   :  { %v110_v11 = vpop.f32.mrf.mxu0 }
  0xea   :  { %123 = vst.msk [vmem:[%s250_s3] sm:$0xf] %vm122_vm2, %v137_v10  ;;  %v111_v12 = vadd.f32 %v131_v6, %v110_v11 }
  0xeb   :  { %v149_v13 = vpop.f32.mrf.mxu0 }
  0xec   :  { %v138_v14 = vpack.c.bf16 %v111_v12, %v111_v12 }
  0xee   :  { %124 = vst.msk [vmem:[%s250_s3 + $0x4] sm:$0xf] %vm122_vm2, %v138_v14 }
  0xef   :  { %129 = vsyncpa [#allocation3], 1 }
  0xf0   :  { %130 = vsyncpa [#allocation5], 1 }

// kernel: decoder_layer.7
= control target key start
LH: loop header
LB: loop body
LE: loop exit
PB: predicated region body
PF: predicated region fallthrough
CT: control target
= control target key end

     0   :  { %v140_v0 = vmov 0.0   ;;  %vm141_vm0 = vmmov 0   ;;  %vm43_vm1 = vcmask 261120   ;;  %vm96_vm2 = vcmask 257024   ;;  %s195_s1 = inlined_call_operand.vmem [shape: bf16[32,96], index: 1, kind: input, shape index: {}]   ;;  %s196_s0 = inlined_call_operand.vmem [shape: f32[16,32], index: 0, kind: input, shape index: {}]   ;;  %s197_s2 = inlined_call_operand.vmem [shape: f32[1,96], index: 2, kind: input, shape index: {}]   ;;  %s198_s3 = inlined_call_operand.vmem [shape: bf16[16,32], index: 3, kind: output, shape index: {0}]   ;;  %s199_s4 = inlined_call_operand.vmem [shape: bf16[16,64], index: 4, kind: output, shape index: {1}]  }
   0x1   :  { %127 = vmatprep.subr.bf16.mxu0 %v140_v0  ;;  %v138_v1 = vld [vmem:[%s195_s1 + $0x8] sm:$0xff]   ;;  %131 = vmatprep.mubr.msk.bf16.mxu0 %vm141_vm0, %v140_v0  ;;  %v139_v2 = vld [vmem:[%s195_s1] sm:$0xff]   ;;  %vm105_vm3 = vcmask 519168  }
   0x2   :  { %128 = vmatpush3.bf16.msra.mxu0 %v138_v1  ;;  %v17_v3 = vld [vmem:[%s196_s0] sm:$0xff]  ;;  %v18_v4 = vld [vmem:[%s196_s0 + $0x8] sm:$0xff]  ;;  %s142_s0 = smov 96  }
   0x3   :  { %129 = vmatprep.subr.bf16.mxu0 %v140_v0  ;;  %v19_v5 = vpack.c.bf16 %v18_v4, %v17_v3  ;;  %v116_v6 = vld [vmem:[%s197_s2] ss:$0 sm:$0xff] }
   0x6   :  { %130 = vmatpush3.bf16.msra.mxu0 %v139_v2 }
   0x9   :  { %132 = vmatmul.mubr.msk.bf16.vlgmr.msra.gmra.mxu0 %vm43_vm1, %v19_v5 }
  0xc9   :  { %v81_v7 = vpop.f32.mrf.mxu0 }
  0xca   :  { %v82_v8 = vadd.f32 %v116_v6, %v81_v7 }
  0xcb   :  { %v133_v9 = vpop.f32.mrf.mxu0 }
  0xcc   :  { %v122_v10 = vpack.c.bf16 %v82_v8, %v82_v8 }
  0xcd   :  { %v84_v11 = vpop.f32.mrf.mxu0 }
  0xce   :  { %97 = vst.msk [vmem:[%s198_s3] sm:$0xf] %vm96_vm2, %v122_v10  ;;  %v85_v12 = vadd.f32 %v116_v6, %v84_v11  ;;  %99 = vrot.lane.b32.xlu0 %v122_v10, %s142_s0 }
  0xcf   :  { %v134_v13 = vpop.f32.mrf.mxu0 }
  0xd0   :  { %v123_v14 = vpack.c.bf16 %v85_v12, %v85_v12 }
  0xd2   :  { %98 = vst.msk [vmem:[%s198_s3 + $0x4] sm:$0xf] %vm96_vm2, %v123_v14  ;;  %101 = vrot.lane.b32.xlu0 %v123_v14, %s142_s0 }
 0x140   :  { %v100_v15 = vpop.permute.xlu0 %99 }
 0x141   :  { %106 = vst.msk [vmem:[%s199_s4] sm:$0xf] %vm105_vm3, %v100_v15 }
 0x144   :  { %v102_v16 = vpop.permute.xlu0 %101 }
 0x145   :  { %107 = vst.msk [vmem:[%s199_s4 + $0x4] sm:$0xf] %vm105_vm3, %v102_v16 }

// kernel: decoder_layer.9
= control target key start
LH: loop header
LB: loop body
LE: loop exit
PB: predicated region body
PF: predicated region fallthrough
CT: control target
= control target key end

     0   :  { %v293_v0 = vmov 0.0   ;;  %vm294_vm0 = vmmov 0   ;;  %vm62_vm1 = vcmask 261120   ;;  %vm234_vm2 = vcmask 257024   ;;  %s398_s2 = inlined_call_operand.vmem [shape: bf16[32,32], index: 2, kind: input, shape index: {}]   ;;  %s399_s0 = inlined_call_operand.vmem [shape: bf16[16,32], index: 0, kind: input, shape index: {}]   ;;  %s400_s3 = inlined_call_operand.vmem [shape: f32[1,32], index: 3, kind: input, shape index: {}]   ;;  %s401_s1 = inlined_call_operand.vmem [shape: f32[16,32], index: 1, kind: input, shape index: {}]   ;;  %s402_s6 = inlined_call_operand.vmem [shape: bf16[32,32], index: 6, kind: input, shape index: {}]   ;;  %s403_s4 = inlined_call_operand.vmem [shape: f32[1,32], index: 4, kind: input, shape index: {}]   ;;  %s404_s5 = inlined_call_operand.vmem [shape: f32[1,32], index: 5, kind: input, shape index: {}]   ;;  %s405_s8 = inlined_call_operand.vmem [shape: f32[16,32], index: 8, kind: output, shape index: {0}]   ;;  %s406_s7 = inlined_call_operand.vmem [shape: f32[1,32], index: 7, kind: input, shape index: {}]   ;;  %s407_s9 = inlined_call_operand.vmem [shape: bf16[16,32], index: 9, kind: output, shape index: {1}]  }
   0x1   :  { %266 = vmatprep.subr.bf16.mxu0 %v293_v0  ;;  %v284_v1 = vld [vmem:[%s398_s2 + $0x8] sm:$0xff]   ;;  %270 = vmatprep.mubr.msk.bf16.mxu0 %vm294_vm0, %v293_v0  ;;  %v285_v2 = vld [vmem:[%s398_s2] sm:$0xff]  }
   0x2   :  { %274 = vmatprep.subr.bf16.mxu1 %v293_v0  ;;  %278 = vmatprep.mubr.msk.bf16.mxu1 %vm294_vm0, %v293_v0  ;;  %v286_v3 = vld [vmem:[%s399_s0] sm:$0xff]   ;;  %v108_v11 = vld [vmem:[%s401_s1 + $0x8] sm:$0xff] }
   0x3   :  { %267 = vmatpush3.bf16.msra.mxu0 %v284_v1  ;;  %v245_v4 = vld [vmem:[%s400_s3] ss:$0 sm:$0xff]  ;;  %v287_v27 = vld [vmem:[%s402_s6 + $0x8] sm:$0xff]  }
   0x4   :  { %268 = vmatprep.subr.bf16.mxu0 %v293_v0  ;;  %v107_v6 = vld [vmem:[%s401_s1] sm:$0xff]  ;;  %275 = vmatpush3.bf16.msra.mxu1 %v287_v27 }
   0x5   :  { %v288_v28 = vld [vmem:[%s402_s6] sm:$0xff]   ;;  %276 = vmatprep.subr.bf16.mxu1 %v293_v0 }
   0x6   :  { %v250_v36 = vld [vmem:[%s403_s4] ss:$0 sm:$0xff] }
   0x7   :  { %269 = vmatpush3.bf16.msra.mxu0 %v285_v2  ;;  %v251_v38 = vld [vmem:[%s404_s5] ss:$0 sm:$0xff] }
   0x8   :  { %277 = vmatpush3.bf16.msra.mxu1 %v288_v28  ;;  %v252_v46 = vld [vmem:[%s406_s7] ss:$0 sm:$0xff] }
   0xa   :  { %271 = vmatmul.mubr.msk.bf16.vlgmr.msra.gmra.mxu0 %vm62_vm1, %v286_v3 }
  0xca   :  { %v100_v5 = vpop.f32.mrf.mxu0 }
  0xcb   :  { %v101_v7 = vadd.f32 %v245_v4, %v100_v5 }
  0xcc   :  { %v272_v8 = vpop.f32.mrf.mxu0 }
  0xcd   :  { %v109_v9 = vadd.f32 %v107_v6, %v101_v7 }
  0xce   :  { %v103_v10 = vpop.f32.mrf.mxu0 }
  0xcf   :  { %v104_v12 = vadd.f32 %v245_v4, %v103_v10  ;;  %v113_v13 = vsel %vm62_vm1, %v109_v9, 0.0 }
  0xd0   :  { %114 = vadd.xlane.f32.xlu0 %v113_v13  ;;  %v273_v14 = vpop.f32.mrf.mxu0 }
  0xd1   :  { %v110_v15 = vadd.f32 %v108_v11, %v104_v12 }
  0xd3   :  { %v116_v16 = vsel %vm62_vm1, %v110_v15, 0.0 }
  0xd4   :  { %117 = vadd.xlane.f32.xlu0 %v116_v16 }
 0x159   :  { %v115_v17 = vpop.xlane.xlu0 %114 }
 0x15a   :  { %v120_v18 = vmul.f32 0.03125, %v115_v17 }
 0x15c   :  { %v122_v19 = vsub.f32 %v109_v9, %v120_v18 }
 0x15d   :  { %v118_v20 = vpop.xlane.xlu0 %117 }
 0x15e   :  { %v121_v21 = vmul.f32 0.03125, %v118_v20  ;;  %v124_v22 = vmul.f32 %v122_v19, %v122_v19 }
 0x160   :  { %v123_v23 = vsub.f32 %v110_v15, %v121_v21  ;;  %v126_v24 = vsel %vm62_vm1, %v124_v22, 0.0 }
 0x161   :  { %127 = vadd.xlane.f32.xlu1 %v126_v24 }
 0x162   :  { %v125_v25 = vmul.f32 %v123_v23, %v123_v23 }
 0x164   :  { %v129_v26 = vsel %vm62_vm1, %v125_v25, 0.0 }
 0x165   :  { %130 = vadd.xlane.f32.xlu1 %v129_v26 }
 0x1ea   :  { %v128_v29 = vpop.xlane.xlu1 %127 }
 0x1eb   :  { %v132_v30 = vmul.f32 0.03125, %v128_v29 }
 0x1ed   :  { %v134_v31 = vadd.f32 1e-05, %v132_v30 }
 0x1ee   :  { %v131_v32 = vpop.xlane.xlu1 %130 }
 0x1ef   :  { %289 = vrsqrt.f32 %v134_v31  ;;  %v133_v33 = vmul.f32 0.03125, %v131_v32 }
 0x1f1   :  { %v135_v34 = vadd.f32 1e-05, %v133_v33 }
 0x1f3   :  { %291 = vrsqrt.f32 %v135_v34 }
 0x1fc   :  { %v290_v35 = vpop.eup %289 }
 0x1fd   :  { %v138_v37 = vmul.f32 %v290_v35, %v122_v19 }
 0x1ff   :  { %v146_v39 = vmul.f32 %v250_v36, %v138_v37 }
 0x200   :  { %v292_v40 = vpop.eup %291 }
 0x201   :  { %v139_v41 = vmul.f32 %v292_v40, %v123_v23  ;;  %v154_v42 = vadd.f32 %v251_v38, %v146_v39 }
 0x203   :  { %v147_v43 = vmul.f32 %v250_v36, %v139_v41  ;;  %156 = vst.msk [vmem:[%s405_s8] sm:$0xff] %vm62_vm1, %v154_v42 }
 0x205   :  { %v155_v44 = vadd.f32 %v251_v38, %v147_v43 }
 0x207   :  { %157 = vst.msk [vmem:[%s405_s8 + $0x8] sm:$0xff] %vm62_vm1, %v155_v44  ;;  %v158_v45 = vpack.c.bf16 %v155_v44, %v154_v42 }
 0x209   :  { %279 = vmatmul.mubr.msk.bf16.vlgmr.msra.gmra.mxu1 %vm62_vm1, %v158_v45 }
 0x2c9   :  { %v219_v47 = vpop.f32.mrf.mxu1 }
 0x2ca   :  { %v220_v48 = vadd.f32 %v252_v46, %v219_v47 }
 0x2cb   :  { %v280_v49 = vpop.f32.mrf.mxu1 }
 0x2cc   :  { %v258_v50 = vpack.c.bf16 %v220_v48, %v220_v48 }
 0x2cd   :  { %v222_v51 = vpop.f32.mrf.mxu1 }
 0x2ce   :  { %235 = vst.msk [vmem:[%s407_s9] sm:$0xf] %vm234_vm2, %v258_v50  ;;  %v223_v52 = vadd.f32 %v252_v46, %v222_v51 }
 0x2cf   :  { %v281_v53 = vpop.f32.mrf.mxu1 }
 0x2d0   :  { %v259_v54 = vpack.c.bf16 %v223_v52, %v223_v52 }
 0x2d2   :  { %236 = vst.msk [vmem:[%s407_s9 + $0x4] sm:$0xf] %vm234_vm2, %v259_v54 }

// kernel: decoder_layer.8
= control target key start
LH: loop header
LB: loop body
LE: loop exit
PB: predicated region body
PF: predicated region fallthrough
CT: control target
= control target key end

     0   :  { %s957_s9 = smov 0   ;;  %s959_s10 = smov 0   ;;  %s1079_s0 = inlined_call_operand.vmem [shape: bf16[2,8,32], index: 0, kind: input, shape index: {}]   ;;  %s1080_s1 = inlined_call_operand.vmem [shape: bf16[2,8,64], index: 1, kind: input, shape index: {}]   ;;  %s1081_s2 = inlined_call_operand.vmem [shape: bf16[2,8,32], index: 2, kind: output, shape index: {}]  }
   0x1   :  { %s961_s11 = smov 0  }
   0x2 LB: > { %s24_s12 = sadd.s32 1, %s924_s10  ;;  %p766_p0 = scmp.ge.s32.totalorder %s928_s11, 1  ;;  %s928_s11 = sphi %s961_s11, %s12_s11   ;;  %s924_s10 = sphi %s959_s10, %s1083_s10   ;;  %s920_s9 = sphi %s957_s9, %s1082_s9  }
   0x3   : > { %p26_p1 = scmp.ge.s32.totalorder %s24_s12, 2  ;;  %p139_p2 = scmp.lt.s32.totalorder %s928_s11, 3 }
   0x5   : > { %s1085_s12 = smov (%p26_p1, %s24_s12), 0  ;;  %p140_p3 = pnand %p766_p0, %p139_p2 }
   0x6   : > { %p169_p4 = scmp.lt.s32.totalorder (!%p140_p3), %s920_s9, 1  ;;  %s932_s20 = smov (!%p140_p3), 96  }
   0x7   : > { %143 = sbr.rel (%p140_p3) target bundleno = 1375 (0x55f), region = 28  ;;  %s933_s21 = smov (!%p140_p3), 120  }
   0x8   : > { %s934_s22 = smov (!%p140_p3), 112   ;;  %s935_s23 = smov (!%p140_p3), 104  }
   0x9   : > { %s936_s27 = smov (!%p140_p3), 88   ;;  %s937_s28 = smov (!%p140_p3), 72  }
   0xa   : > { %s938_s29 = smov (!%p140_p3), 80   ;;  %s939_s30 = smov (!%p140_p3), 8  }
   0xb   : > { %s940_s3 = smov (!%p140_p3), 16   ;;  %s941_s4 = smov (!%p140_p3), 24  }
   0xc   : > { %v930_v0 = vmov 0.0   ;;  %vm931_vm0 = vmmov 0   ;;  %s1087_s9 = smov (!%p169_p4, %s920_s9), 1  ;;  %vm198_vm1 = vcmask 64512   ;;  %v191_v4 = vlaneseq }
   0xd   : > { %804 = vmatprep.subr.bf16.mxu0 %v930_v0  ;;  %806 = vmatprep.mubr.msk.bf16.mxu0 %vm931_vm0, %v930_v0  ;;  %s981_s13 = sshll.u32 %s1087_s9, 2  ;;  %vm266_vm3 = vcmask 1043456   ;;  %vm311_vm4 = vcmask 60416   ;;  %vm434_vm5 = vcmask 126016   ;;  %vm554_vm6 = vcmask 191616  }
   0xe   : > { %810 = vmatprep.subr.bf16.mxu1 %v930_v0  ;;  %812 = vmatprep.mubr.msk.bf16.mxu1 %vm931_vm0, %v930_v0  ;;  %s179_s16 = scalar_lea.vmem %s1080_s1, %s981_s13  ;;  %s175_s19 = scalar_lea.vmem %s1079_s0, %s981_s13  ;;  %v996_v5 = vshrl.u32 %v191_v4, 7  ;;  %v998_v6 = vand.u32 127, %v191_v4  ;;  %vm674_vm7 = vcmask 257216  }
   0xf   : > { %v189_v1 = vld [vmem:[%s179_s16] sm:$0xf]  ;;  %s1034_s26 = scalar_lea.vmem %s1081_s2, %s981_s13 }
  0x10   : > { %v203_v2 = vsel %vm198_vm1, %v189_v1, 0  ;;  %v188_v3 = vld [vmem:[%s175_s19] sm:$0xf]  ;;  %vm197_vm2 = vcmp.le.s32.totalorder %v998_v6, %v996_v5  ;;  %v1006_v13 = vcombine.low %v189_v1, %v189_v1 }
  0x11   : > { %805 = vmatpush3.bf16.xpose.msra.mxu0 %v203_v2  ;;  %v773_v14 = vcombine.low %v188_v3, %v188_v3 }
  0x12   : > { %822 = vmatprep.subr.bf16.mxu0 %v930_v0  ;;  %261 = vrot.lane.b32.xlu1 %v1006_v13, %s932_s20 }
  0x16   : > { %318 = vrot.lane.b32.xlu1 %v1006_v13, %s933_s21 }
  0x18   : > { %807 = vmatmul.mubr.msk.bf16.vlgmr.msra.gmra.mxu0 %vm198_vm1, %v188_v3 }
  0x19   : > { %824 = vmatprep.mubr.msk.bf16.mxu0 %vm931_vm0, %v930_v0 }
  0x1a   : > { %438 = vrot.lane.b32.xlu1 %v1006_v13, %s934_s22 }
  0x1e   : > { %436 = vrot.lane.b32.xlu1 %v773_v14, %s934_s22 }
  0x22   : > { %558 = vrot.lane.b32.xlu1 %v1006_v13, %s935_s23 }
  0x26   : > { %556 = vrot.lane.b32.xlu1 %v773_v14, %s935_s23 }
  0x84   : > { %v262_v20 = vpop.permute.xlu1 %261 }
  0x85   : > { %v268_v21 = vsel %vm266_vm3, %v262_v20, 0 }
  0x86   : > { %811 = vmatpush3.bf16.msra.mxu1 %v268_v21 }
  0x87   : > { %816 = vmatprep.subr.bf16.mxu1 %v930_v0 }
  0x88   : > { %v319_v24 = vpop.permute.xlu1 %318 }
  0x89   : > { %v324_v26 = vsel %vm198_vm1, %v319_v24, 0 }
  0x8c   : > { %v439_v28 = vpop.permute.xlu1 %438 }
  0x8d   : > { %v444_v31 = vsel %vm198_vm1, %v439_v28, 0 }
  0x90   : > { %v437_v30 = vpop.permute.xlu1 %436 }
  0x94   : > { %v559_v32 = vpop.permute.xlu1 %558 }
  0x95   : > { %v564_v33 = vsel %vm198_vm1, %v559_v32, 0 }
  0x98   : > { %v557_v34 = vpop.permute.xlu1 %556 }
  0xd8   : > { %v239_v7 = vpop.f32.mrf.mxu0 }
  0xd9   : > { %v245_v8 = vsel %vm197_vm2, %v239_v7, -1e+30 }
  0xda   : > { %v808_v9 = vpop.f32.mrf.mxu0  ;;  %v246_v10 = vsel %vm198_vm1, %v245_v8, -inf }
  0xdb   : > { %247 = vmax.xlane.f32.xlu0 %v246_v10 }
  0xdc   : > { %v242_v11 = vpop.f32.mrf.mxu0 }
  0xde   : > { %v809_v12 = vpop.f32.mrf.mxu0 }
 0x164   : > { %v248_v15 = vpop.xlane.xlu0 %247 }
 0x165   : > { %v249_v16 = vsub.f32 %v245_v8, %v248_v15 }
 0x167   : > { %v250_v17 = vmul.f32 1.442695, %v249_v16 }
 0x169   : > { %890 = vpow2.f32 %v250_v17 }
 0x176   : > { %v891_v18 = vpop.eup %890 }
 0x177   : > { %v252_v19 = vsel %vm198_vm1, %v891_v18, 0.0 }
 0x178   : > { %253 = vadd.xlane.f32.xlu0 %v252_v19 }
 0x18e   : > { %316 = vrot.lane.b32.xlu0 %v773_v14, %s933_s21 }
 0x201   : > { %v254_v22 = vpop.xlane.xlu0 %253 }
 0x202   : > { %892 = vrcp.f32 %v254_v22 }
 0x205   : > { %v317_v29 = vpop.permute.xlu0 %316 }
 0x20f   : > { %v893_v23 = vpop.eup %892 }
 0x210   : > { %v256_v25 = vmul.f32 %v893_v23, %v891_v18 }
 0x212   : > { %v257_v27 = vpack.c.bf16 %v256_v25, %v256_v25 }
 0x214   : > { %813 = vmatmul.mubr.msk.bf16.vlgmr.msra.gmra.mxu1 %vm198_vm1, %v257_v27 }
 0x215   : > { %817 = vmatpush3.bf16.xpose.msra.mxu1 %v324_v26  ;;  %818 = vmatprep.mubr.msk.bf16.mxu1 %vm931_vm0, %v930_v0 }
 0x216   : > { %828 = vmatprep.subr.bf16.mxu1 %v930_v0 }
 0x21c   : > { %819 = vmatmul.mubr.msk.bf16.vlgmr.msra.gmra.mxu1 %vm198_vm1, %v317_v29 }
 0x21d   : > { %829 = vmatpush3.bf16.xpose.msra.mxu1 %v444_v31  ;;  %830 = vmatprep.mubr.msk.bf16.mxu1 %vm931_vm0, %v930_v0 }
 0x21e   : > { %840 = vmatprep.subr.bf16.mxu1 %v930_v0 }
 0x224   : > { %831 = vmatmul.mubr.msk.bf16.vlgmr.msra.gmra.mxu1 %vm198_vm1, %v437_v30 }
 0x225   : > { %841 = vmatpush3.bf16.xpose.msra.mxu1 %v564_v33  ;;  %842 = vmatprep.mubr.msk.bf16.mxu1 %vm931_vm0, %v930_v0 }
 0x22c   : > { %843 = vmatmul.mubr.msk.bf16.vlgmr.msra.gmra.mxu1 %vm198_vm1, %v557_v34 }
 0x2d4   : > { %v304_v35 = vpop.f32.mrf.mxu1 }
 0x2d5   : > { %v310_v36 = vpack.c.bf16 %v304_v35, %v304_v35 }
 0x2d6   : > { %v814_v37 = vpop.f32.mrf.mxu1 }
 0x2d7   : > { %312 = vst.msk [vmem:[%s1034_s26] sm:$0xf] %vm311_vm4, %v310_v36 }
 0x2d8   : > { %v307_v38 = vpop.f32.mrf.mxu1 }
 0x2da   : > { %v815_v39 = vpop.f32.mrf.mxu1 }
 0x2dc   : > { %v360_v40 = vpop.f32.mrf.mxu1 }
 0x2dd   : > { %v366_v41 = vsel %vm197_vm2, %v360_v40, -1e+30 }
 0x2de   : > { %v820_v42 = vpop.f32.mrf.mxu1  ;;  %v367_v43 = vsel %vm198_vm1, %v366_v41, -inf }
 0x2df   : > { %368 = vmax.xlane.f32.xlu1 %v367_v43 }
 0x2e0   : > { %v363_v44 = vpop.f32.mrf.mxu1 }
 0x2e2   : > { %v821_v45 = vpop.f32.mrf.mxu1 }
 0x2e4   : > { %v480_v46 = vpop.f32.mrf.mxu1 }
 0x2e5   : > { %v486_v47 = vsel %vm197_vm2, %v480_v46, -1e+30 }
 0x2e6   : > { %v832_v48 = vpop.f32.mrf.mxu1  ;;  %v487_v49 = vsel %vm198_vm1, %v486_v47, -inf }
 0x2e7   : > { %488 = vmax.xlane.f32.xlu0 %v487_v49 }
 0x2e8   : > { %v483_v50 = vpop.f32.mrf.mxu1 }
 0x2ea   : > { %v833_v51 = vpop.f32.mrf.mxu1 }
 0x2ec   : > { %v600_v52 = vpop.f32.mrf.mxu1 }
 0x2ed   : > { %v606_v53 = vsel %vm197_vm2, %v600_v52, -1e+30 }
 0x2ee   : > { %v844_v54 = vpop.f32.mrf.mxu1  ;;  %v607_v55 = vsel %vm198_vm1, %v606_v53, -inf }
 0x2ef   : > { %608 = vmax.xlane.f32.xlu1 %v607_v55 }
 0x2f0   : > { %v603_v56 = vpop.f32.mrf.mxu1 }
 0x2f2   : > { %v845_v57 = vpop.f32.mrf.mxu1 }
 0x300   : > { %379 = vrot.lane.b32.xlu1 %v1006_v13, %s936_s27 }
 0x368   : > { %v369_v58 = vpop.xlane.xlu1 %368 }
 0x369   : > { %v370_v59 = vsub.f32 %v366_v41, %v369_v58 }
 0x36b   : > { %v371_v60 = vmul.f32 1.442695, %v370_v59 }
 0x36d   : > { %894 = vpow2.f32 %v371_v60 }
 0x370   : > { %v489_v61 = vpop.xlane.xlu0 %488 }
 0x371   : > { %v490_v62 = vsub.f32 %v486_v47, %v489_v61 }
 0x373   : > { %v491_v63 = vmul.f32 1.442695, %v490_v62 }
 0x375   : > { %896 = vpow2.f32 %v491_v63 }
 0x378   : > { %v609_v1 = vpop.xlane.xlu1 %608 }
 0x379   : > { %v610_v2 = vsub.f32 %v606_v53, %v609_v1 }
 0x37a   : > { %v895_v3 = vpop.eup %894 }
 0x37b   : > { %v611_v4 = vmul.f32 1.442695, %v610_v2  ;;  %v373_v5 = vsel %vm198_vm1, %v895_v3, 0.0 }
 0x37c   : > { %374 = vadd.xlane.f32.xlu0 %v373_v5  ;;  %v380_v6 = vpop.permute.xlu1 %379 }
 0x37d   : > { %898 = vpow2.f32 %v611_v4  ;;  %v385_v7 = vsel %vm266_vm3, %v380_v6, 0 }
 0x37e   : > { %823 = vmatpush3.bf16.msra.mxu0 %v385_v7 }
 0x37f   : > { %834 = vmatprep.subr.bf16.mxu0 %v930_v0 }
 0x382   : > { %v897_v8 = vpop.eup %896 }
 0x383   : > { %v493_v9 = vsel %vm198_vm1, %v897_v8, 0.0 }
 0x384   : > { %494 = vadd.xlane.f32.xlu1 %v493_v9 }
 0x38a   : > { %v899_v10 = vpop.eup %898 }
 0x38b   : > { %v613_v11 = vsel %vm198_vm1, %v899_v10, 0.0 }
 0x38c   : > { %614 = vadd.xlane.f32.xlu0 %v613_v11 }
 0x395   : > { %619 = vrot.lane.b32.xlu1 %v1006_v13, %s937_s28 }
 0x3a2   : > { %499 = vrot.lane.b32.xlu0 %v1006_v13, %s938_s29 }
 0x405   : > { %v375_v12 = vpop.xlane.xlu0 %374 }
 0x406   : > { %900 = vrcp.f32 %v375_v12 }
 0x40d   : > { %v495_v14 = vpop.xlane.xlu1 %494 }
 0x40e   : > { %902 = vrcp.f32 %v495_v14 }
 0x411   : > { %v620_v13 = vpop.permute.xlu1 %619 }
 0x412   : > { %v625_v24 = vsel %vm266_vm3, %v620_v13, 0 }
 0x413   : > { %v901_v15 = vpop.eup %900 }
 0x414   : > { %v377_v16 = vmul.f32 %v901_v15, %v895_v3 }
 0x415   : > { %v615_v17 = vpop.xlane.xlu0 %614 }
 0x416   : > { %904 = vrcp.f32 %v615_v17  ;;  %v378_v18 = vpack.c.bf16 %v377_v16, %v377_v16 }
 0x418   : > { %825 = vmatmul.mubr.msk.bf16.vlgmr.msra.gmra.mxu0 %vm198_vm1, %v378_v18 }
 0x419   : > { %v500_v19 = vpop.permute.xlu0 %499  ;;  %836 = vmatprep.mubr.msk.bf16.mxu0 %vm931_vm0, %v930_v0 }
 0x41a   : > { %v505_v20 = vsel %vm266_vm3, %v500_v19, 0 }
 0x41b   : > { %v903_v21 = vpop.eup %902  ;;  %835 = vmatpush3.bf16.msra.mxu0 %v505_v20 }
 0x41c   : > { %v497_v22 = vmul.f32 %v903_v21, %v897_v8  ;;  %846 = vmatprep.subr.bf16.mxu0 %v930_v0 }
 0x41e   : > { %v498_v23 = vpack.c.bf16 %v497_v22, %v497_v22 }
 0x420   : > { %837 = vmatmul.mubr.msk.bf16.vlgmr.msra.gmra.mxu0 %vm198_vm1, %v498_v23 }
 0x421   : > { %847 = vmatpush3.bf16.msra.mxu0 %v625_v24  ;;  %848 = vmatprep.mubr.msk.bf16.mxu0 %vm931_vm0, %v930_v0 }
 0x423   : > { %v905_v25 = vpop.eup %904 }
 0x424   : > { %v617_v26 = vmul.f32 %v905_v25, %v899_v10 }
 0x426   : > { %v618_v27 = vpack.c.bf16 %v617_v26, %v617_v26 }
 0x428   : > { %849 = vmatmul.mubr.msk.bf16.vlgmr.msra.gmra.mxu0 %vm198_vm1, %v618_v27 }
 0x4d8   : > { %v421_v28 = vpop.f32.mrf.mxu0 }
 0x4d9   : > { %v785_v29 = vpack.c.bf16 %v421_v28, %v421_v28 }
 0x4da   : > { %v826_v30 = vpop.f32.mrf.mxu0 }
 0x4db   : > { %431 = vrot.lane.b32.xlu1 %v785_v29, %s939_s30 }
 0x4dc   : > { %v424_v31 = vpop.f32.mrf.mxu0 }
 0x4de   : > { %v827_v32 = vpop.f32.mrf.mxu0 }
 0x4e0   : > { %v541_v33 = vpop.f32.mrf.mxu0 }
 0x4e1   : > { %v786_v34 = vpack.c.bf16 %v541_v33, %v541_v33 }
 0x4e2   : > { %v838_v35 = vpop.f32.mrf.mxu0 }
 0x4e3   : > { %551 = vrot.lane.b32.xlu0 %v786_v34, %s940_s3 }
 0x4e4   : > { %v544_v0 = vpop.f32.mrf.mxu0 }
 0x4e6   : > { %v839_v36 = vpop.f32.mrf.mxu0 }
 0x4e8   : > { %v661_v37 = vpop.f32.mrf.mxu0 }
 0x4e9   : > { %v787_v38 = vpack.c.bf16 %v661_v37, %v661_v37 }
 0x4ea   : > { %v850_v39 = vpop.f32.mrf.mxu0 }
 0x4eb   : > { %671 = vrot.lane.b32.xlu1 %v787_v38, %s941_s4 }
 0x4ec   : > { %v664_v40 = vpop.f32.mrf.mxu0 }
 0x4ee   : > { %v851_v41 = vpop.f32.mrf.mxu0 }
 0x54d   : > { %v432_v42 = vpop.permute.xlu1 %431 }
 0x54e   : > { %435 = vst.msk [vmem:[%s1034_s26] sm:$0xf] %vm434_vm5, %v432_v42 }
 0x555   : > { %v552_v43 = vpop.permute.xlu0 %551 }
 0x556   : > { %555 = vst.msk [vmem:[%s1034_s26] sm:$0xf] %vm554_vm6, %v552_v43 }
 0x55d   : > { %v672_v44 = vpop.permute.xlu1 %671 }
 0x55e   : > { %675 = vst.msk [vmem:[%s1034_s26] sm:$0xf] %vm674_vm7, %v672_v44 }
 0x55f PF: > { %s12_s11 = sadd.s32 1, %s928_s11   ;;  %s1082_s9 = smov %s924_s10 }
 0x560   : > { %p9_p5 = scmp.ge.s32.totalorder %s12_s11, 4   ;;  %s1083_s10 = smov %s1085_s12 }
 0x562   :  { %11 = sbr.rel (!%p9_p5) target bundleno = 2 (0x2), region = 61 }

// kernel: decoder_layer.12
= control target key start
LH: loop header
LB: loop body
LE: loop exit
PB: predicated region body
PF: predicated region fallthrough
CT: control target
= control target key end

     0   :  { %v181_v0 = vmov 0.0   ;;  %vm182_vm0 = vmmov 0   ;;  %vm54_vm1 = vcmask 261120   ;;  %s255_s2 = inlined_call_operand.vmem [shape: bf16[32,32], index: 2, kind: input, shape index: {}]   ;;  %s256_s0 = inlined_call_operand.vmem [shape: bf16[16,32], index: 0, kind: input, shape index: {}]   ;;  %s257_s3 = inlined_call_operand.vmem [shape: f32[1,32], index: 3, kind: input, shape index: {}]   ;;  %s258_s1 = inlined_call_operand.vmem [shape: f32[16,32], index: 1, kind: input, shape index: {}]   ;;  %s259_s4 = inlined_call_operand.vmem [shape: f32[1,32], index: 4, kind: input, shape index: {}]   ;;  %s260_s5 = inlined_call_operand.vmem [shape: f32[1,32], index: 5, kind: input, shape index: {}]   ;;  %s261_s6 = inlined_call_operand.vmem [shape: f32[16,32], index: 6, kind: output, shape index: {}]  }
   0x1   :  { %164 = vmatprep.subr.bf16.mxu0 %v181_v0  ;;  %v174_v1 = vld [vmem:[%s255_s2 + $0x8] sm:$0xff]   ;;  %168 = vmatprep.mubr.msk.bf16.mxu0 %vm182_vm0, %v181_v0  ;;  %v175_v2 = vld [vmem:[%s255_s2] sm:$0xff]  }
   0x2   :  { %165 = vmatpush3.bf16.msra.mxu0 %v174_v1  ;;  %v176_v3 = vld [vmem:[%s256_s0] sm:$0xff]   ;;  %v100_v11 = vld [vmem:[%s258_s1 + $0x8] sm:$0xff] }
   0x3   :  { %166 = vmatprep.subr.bf16.mxu0 %v181_v0  ;;  %v154_v4 = vld [vmem:[%s257_s3] ss:$0 sm:$0xff] }
   0x4   :  { %v99_v6 = vld [vmem:[%s258_s1] sm:$0xff] }
   0x5   :  { %v159_v34 = vld [vmem:[%s259_s4] ss:$0 sm:$0xff] }
   0x6   :  { %167 = vmatpush3.bf16.msra.mxu0 %v175_v2  ;;  %v160_v36 = vld [vmem:[%s260_s5] ss:$0 sm:$0xff] }
   0x9   :  { %169 = vmatmul.mubr.msk.bf16.vlgmr.msra.gmra.mxu0 %vm54_vm1, %v176_v3 }
  0xc9   :  { %v92_v5 = vpop.f32.mrf.mxu0 }
  0xca   :  { %v93_v7 = vadd.f32 %v154_v4, %v92_v5 }
  0xcb   :  { %v170_v8 = vpop.f32.mrf.mxu0 }
  0xcc   :  { %v101_v9 = vadd.f32 %v99_v6, %v93_v7 }
  0xcd   :  { %v95_v10 = vpop.f32.mrf.mxu0 }
  0xce   :  { %v96_v12 = vadd.f32 %v154_v4, %v95_v10  ;;  %v105_v13 = vsel %vm54_vm1, %v101_v9, 0.0 }
  0xcf   :  { %106 = vadd.xlane.f32.xlu0 %v105_v13  ;;  %v171_v14 = vpop.f32.mrf.mxu0 }
  0xd0   :  { %v102_v15 = vadd.f32 %v100_v11, %v96_v12 }
  0xd2   :  { %v108_v16 = vsel %vm54_vm1, %v102_v15, 0.0 }
  0xd3   :  { %109 = vadd.xlane.f32.xlu0 %v108_v16 }
 0x158   :  { %v107_v17 = vpop.xlane.xlu0 %106 }
 0x159   :  { %v112_v18 = vmul.f32 0.03125, %v107_v17 }
 0x15b   :  { %v114_v19 = vsub.f32 %v101_v9, %v112_v18 }
 0x15c   :  { %v110_v20 = vpop.xlane.xlu0 %109 }
 0x15d   :  { %v113_v21 = vmul.f32 0.03125, %v110_v20  ;;  %v116_v22 = vmul.f32 %v114_v19, %v114_v19 }
 0x15f   :  { %v115_v23 = vsub.f32 %v102_v15, %v113_v21  ;;  %v118_v24 = vsel %vm54_vm1, %v116_v22, 0.0 }
 0x160   :  { %119 = vadd.xlane.f32.xlu1 %v118_v24 }
 0x161   :  { %v117_v25 = vmul.f32 %v115_v23, %v115_v23 }
 0x163   :  { %v121_v26 = vsel %vm54_vm1, %v117_v25, 0.0 }
 0x164   :  { %122 = vadd.xlane.f32.xlu1 %v121_v26 }
 0x1e9   :  { %v120_v27 = vpop.xlane.xlu1 %119 }
 0x1ea   :  { %v124_v28 = vmul.f32 0.03125, %v120_v27 }
 0x1ec   :  { %v126_v29 = vadd.f32 1e-05, %v124_v28 }
 0x1ed   :  { %v123_v30 = vpop.xlane.xlu1 %122 }
 0x1ee   :  { %177 = vrsqrt.f32 %v126_v29  ;;  %v125_v31 = vmul.f32 0.03125, %v123_v30 }
 0x1f0   :  { %v127_v32 = vadd.f32 1e-05, %v125_v31 }
 0x1f2   :  { %179 = vrsqrt.f32 %v127_v32 }
 0x1fb   :  { %v178_v33 = vpop.eup %177 }
 0x1fc   :  { %v130_v35 = vmul.f32 %v178_v33, %v114_v19 }
 0x1fe   :  { %v138_v37 = vmul.f32 %v159_v34, %v130_v35 }
 0x1ff   :  { %v180_v38 = vpop.eup %179 }
 0x200   :  { %v146_v39 = vadd.f32 %v160_v36, %v138_v37  ;;  %v131_v40 = vmul.f32 %v180_v38, %v115_v23 }
 0x202   :  { %148 = vst.msk [vmem:[%s261_s6] sm:$0xff] %vm54_vm1, %v146_v39  ;;  %v139_v41 = vmul.f32 %v159_v34, %v131_v40 }
 0x204   :  { %v147_v42 = vadd.f32 %v160_v36, %v139_v41 }
 0x206   :  { %149 = vst.msk [vmem:[%s261_s6 + $0x8] sm:$0xff] %vm54_vm1, %v147_v42 }

// kernel: decoder_layer.11
= control target key start
LH: loop header
LB: loop body
LE: loop exit
PB: predicated region body
PF: predicated region fallthrough
CT: control target
= control target key end

     0   :  { %s945_s9 = smov 0   ;;  %s947_s10 = smov 0   ;;  %s1049_s0 = inlined_call_operand.vmem [shape: bf16[2,8,32], index: 0, kind: input, shape index: {}]   ;;  %s1050_s1 = inlined_call_operand.vmem [shape: bf16[2,8,64], index: 1, kind: input, shape index: {}]   ;;  %s1051_s2 = inlined_call_operand.vmem [shape: bf16[2,8,32], index: 2, kind: output, shape index: {}]  }
   0x1   :  { %s949_s11 = smov 0  }
   0x2 LB: > { %s24_s12 = sadd.s32 1, %s912_s10  ;;  %p754_p0 = scmp.ge.s32.totalorder %s916_s11, 1  ;;  %s916_s11 = sphi %s949_s11, %s12_s11   ;;  %s912_s10 = sphi %s947_s10, %s1053_s10   ;;  %s908_s9 = sphi %s945_s9, %s1052_s9  }
   0x3   : > { %p26_p1 = scmp.ge.s32.totalorder %s24_s12, 2  ;;  %p139_p2 = scmp.lt.s32.totalorder %s916_s11, 3 }
   0x5   : > { %s1055_s12 = smov (%p26_p1, %s24_s12), 0  ;;  %p140_p3 = pnand %p754_p0, %p139_p2 }
   0x6   : > { %p169_p4 = scmp.lt.s32.totalorder (!%p140_p3), %s908_s9, 1  ;;  %s920_s20 = smov (!%p140_p3), 96  }
   0x7   : > { %143 = sbr.rel (%p140_p3) target bundleno = 1373 (0x55d), region = 28  ;;  %s921_s21 = smov (!%p140_p3), 120  }
   0x8   : > { %s922_s22 = smov (!%p140_p3), 112   ;;  %s923_s23 = smov (!%p140_p3), 104  }
   0x9   : > { %s924_s27 = smov (!%p140_p3), 88   ;;  %s925_s28 = smov (!%p140_p3), 72  }
   0xa   : > { %s926_s29 = smov (!%p140_p3), 80   ;;  %s927_s30 = smov (!%p140_p3), 8  }
   0xb   : > { %s928_s3 = smov (!%p140_p3), 16   ;;  %s929_s4 = smov (!%p140_p3), 24  }
   0xc   : > { %v918_v0 = vmov 0.0   ;;  %vm919_vm0 = vmmov 0   ;;  %s1057_s9 = smov (!%p169_p4, %s908_s9), 1  ;;  %vm190_vm1 = vcmask 64512   ;;  %vm257_vm2 = vcmask 1043456  }
   0xd   : > { %792 = vmatprep.subr.bf16.mxu0 %v918_v0  ;;  %794 = vmatprep.mubr.msk.bf16.mxu0 %vm919_vm0, %v918_v0  ;;  %s969_s13 = sshll.u32 %s1057_s9, 2  ;;  %vm302_vm3 = vcmask 60416   ;;  %vm424_vm4 = vcmask 126016   ;;  %vm543_vm5 = vcmask 191616   ;;  %vm662_vm6 = vcmask 257216  }
   0xe   : > { %798 = vmatprep.subr.bf16.mxu1 %v918_v0  ;;  %800 = vmatprep.mubr.msk.bf16.mxu1 %vm919_vm0, %v918_v0  ;;  %s179_s16 = scalar_lea.vmem %s1050_s1, %s969_s13  ;;  %s175_s19 = scalar_lea.vmem %s1049_s0, %s969_s13 }
   0xf   : > { %v189_v1 = vld [vmem:[%s179_s16] sm:$0xf]  ;;  %s1013_s26 = scalar_lea.vmem %s1051_s2, %s969_s13 }
  0x10   : > { %v195_v2 = vsel %vm190_vm1, %v189_v1, 0  ;;  %v188_v3 = vld [vmem:[%s175_s19] sm:$0xf]  ;;  %v985_v9 = vcombine.low %v189_v1, %v189_v1 }
  0x11   : > { %793 = vmatpush3.bf16.xpose.msra.mxu0 %v195_v2  ;;  %v761_v10 = vcombine.low %v188_v3, %v188_v3 }
  0x12   : > { %810 = vmatprep.subr.bf16.mxu0 %v918_v0  ;;  %252 = vrot.lane.b32.xlu1 %v985_v9, %s920_s20 }
  0x16   : > { %309 = vrot.lane.b32.xlu1 %v985_v9, %s921_s21 }
  0x18   : > { %795 = vmatmul.mubr.msk.bf16.vlgmr.msra.gmra.mxu0 %vm190_vm1, %v188_v3 }
  0x19   : > { %812 = vmatprep.mubr.msk.bf16.mxu0 %vm919_vm0, %v918_v0 }
  0x1a   : > { %428 = vrot.lane.b32.xlu1 %v985_v9, %s922_s22 }
  0x1e   : > { %426 = vrot.lane.b32.xlu1 %v761_v10, %s922_s22 }
  0x22   : > { %547 = vrot.lane.b32.xlu1 %v985_v9, %s923_s23 }
  0x26   : > { %545 = vrot.lane.b32.xlu1 %v761_v10, %s923_s23 }
  0x84   : > { %v253_v16 = vpop.permute.xlu1 %252 }
  0x85   : > { %v259_v17 = vsel %vm257_vm2, %v253_v16, 0 }
  0x86   : > { %799 = vmatpush3.bf16.msra.mxu1 %v259_v17 }
  0x87   : > { %804 = vmatprep.subr.bf16.mxu1 %v918_v0 }
  0x88   : > { %v310_v20 = vpop.permute.xlu1 %309 }
  0x89   : > { %v315_v22 = vsel %vm190_vm1, %v310_v20, 0 }
  0x8c   : > { %v429_v24 = vpop.permute.xlu1 %428 }
  0x8d   : > { %v434_v27 = vsel %vm190_vm1, %v429_v24, 0 }
  0x90   : > { %v427_v26 = vpop.permute.xlu1 %426 }
  0x94   : > { %v548_v28 = vpop.permute.xlu1 %547 }
  0x95   : > { %v553_v29 = vsel %vm190_vm1, %v548_v28, 0 }
  0x98   : > { %v546_v30 = vpop.permute.xlu1 %545 }
  0xd8   : > { %v231_v4 = vpop.f32.mrf.mxu0 }
  0xd9   : > { %v237_v5 = vsel %vm190_vm1, %v231_v4, -inf }
  0xda   : > { %238 = vmax.xlane.f32.xlu0 %v237_v5  ;;  %v796_v6 = vpop.f32.mrf.mxu0 }
  0xdc   : > { %v234_v7 = vpop.f32.mrf.mxu0 }
  0xde   : > { %v797_v8 = vpop.f32.mrf.mxu0 }
 0x163   : > { %v239_v11 = vpop.xlane.xlu0 %238 }
 0x164   : > { %v240_v12 = vsub.f32 %v231_v4, %v239_v11 }
 0x166   : > { %v241_v13 = vmul.f32 1.442695, %v240_v12 }
 0x168   : > { %878 = vpow2.f32 %v241_v13 }
 0x175   : > { %v879_v14 = vpop.eup %878 }
 0x176   : > { %v243_v15 = vsel %vm190_vm1, %v879_v14, 0.0 }
 0x177   : > { %244 = vadd.xlane.f32.xlu0 %v243_v15 }
 0x18d   : > { %307 = vrot.lane.b32.xlu0 %v761_v10, %s921_s21 }
 0x200   : > { %v245_v18 = vpop.xlane.xlu0 %244 }
 0x201   : > { %880 = vrcp.f32 %v245_v18 }
 0x204   : > { %v308_v25 = vpop.permute.xlu0 %307 }
 0x20e   : > { %v881_v19 = vpop.eup %880 }
 0x20f   : > { %v247_v21 = vmul.f32 %v881_v19, %v879_v14 }
 0x211   : > { %v248_v23 = vpack.c.bf16 %v247_v21, %v247_v21 }
 0x213   : > { %801 = vmatmul.mubr.msk.bf16.vlgmr.msra.gmra.mxu1 %vm190_vm1, %v248_v23 }
 0x214   : > { %805 = vmatpush3.bf16.xpose.msra.mxu1 %v315_v22  ;;  %806 = vmatprep.mubr.msk.bf16.mxu1 %vm919_vm0, %v918_v0 }
 0x215   : > { %816 = vmatprep.subr.bf16.mxu1 %v918_v0 }
 0x21b   : > { %807 = vmatmul.mubr.msk.bf16.vlgmr.msra.gmra.mxu1 %vm190_vm1, %v308_v25 }
 0x21c   : > { %817 = vmatpush3.bf16.xpose.msra.mxu1 %v434_v27  ;;  %818 = vmatprep.mubr.msk.bf16.mxu1 %vm919_vm0, %v918_v0 }
 0x21d   : > { %828 = vmatprep.subr.bf16.mxu1 %v918_v0 }
 0x223   : > { %819 = vmatmul.mubr.msk.bf16.vlgmr.msra.gmra.mxu1 %vm190_vm1, %v427_v26 }
 0x224   : > { %829 = vmatpush3.bf16.xpose.msra.mxu1 %v553_v29  ;;  %830 = vmatprep.mubr.msk.bf16.mxu1 %vm919_vm0, %v918_v0 }
 0x22b   : > { %831 = vmatmul.mubr.msk.bf16.vlgmr.msra.gmra.mxu1 %vm190_vm1, %v546_v30 }
 0x2d3   : > { %v295_v31 = vpop.f32.mrf.mxu1 }
 0x2d4   : > { %v301_v32 = vpack.c.bf16 %v295_v31, %v295_v31 }
 0x2d5   : > { %v802_v33 = vpop.f32.mrf.mxu1 }
 0x2d6   : > { %303 = vst.msk [vmem:[%s1013_s26] sm:$0xf] %vm302_vm3, %v301_v32 }
 0x2d7   : > { %v298_v34 = vpop.f32.mrf.mxu1 }
 0x2d9   : > { %v803_v35 = vpop.f32.mrf.mxu1 }
 0x2db   : > { %v351_v36 = vpop.f32.mrf.mxu1 }
 0x2dc   : > { %v357_v37 = vsel %vm190_vm1, %v351_v36, -inf }
 0x2dd   : > { %358 = vmax.xlane.f32.xlu1 %v357_v37  ;;  %v808_v38 = vpop.f32.mrf.mxu1 }
 0x2df   : > { %v354_v39 = vpop.f32.mrf.mxu1 }
 0x2e1   : > { %v809_v40 = vpop.f32.mrf.mxu1 }
 0x2e3   : > { %v470_v41 = vpop.f32.mrf.mxu1 }
 0x2e4   : > { %v476_v42 = vsel %vm190_vm1, %v470_v41, -inf }
 0x2e5   : > { %477 = vmax.xlane.f32.xlu0 %v476_v42  ;;  %v820_v43 = vpop.f32.mrf.mxu1 }
 0x2e7   : > { %v473_v44 = vpop.f32.mrf.mxu1 }
 0x2e9   : > { %v821_v45 = vpop.f32.mrf.mxu1 }
 0x2eb   : > { %v589_v46 = vpop.f32.mrf.mxu1 }
 0x2ec   : > { %v595_v47 = vsel %vm190_vm1, %v589_v46, -inf }
 0x2ed   : > { %596 = vmax.xlane.f32.xlu1 %v595_v47  ;;  %v832_v48 = vpop.f32.mrf.mxu1 }
 0x2ef   : > { %v592_v49 = vpop.f32.mrf.mxu1 }
 0x2f1   : > { %v833_v50 = vpop.f32.mrf.mxu1 }
 0x2fe   : > { %369 = vrot.lane.b32.xlu1 %v985_v9, %s924_s27 }
 0x366   : > { %v359_v51 = vpop.xlane.xlu1 %358 }
 0x367   : > { %v360_v52 = vsub.f32 %v351_v36, %v359_v51 }
 0x369   : > { %v361_v53 = vmul.f32 1.442695, %v360_v52 }
 0x36b   : > { %882 = vpow2.f32 %v361_v53 }
 0x36e   : > { %v478_v54 = vpop.xlane.xlu0 %477 }
 0x36f   : > { %v479_v55 = vsub.f32 %v470_v41, %v478_v54 }
 0x371   : > { %v480_v56 = vmul.f32 1.442695, %v479_v55 }
 0x373   : > { %884 = vpow2.f32 %v480_v56 }
 0x376   : > { %v597_v57 = vpop.xlane.xlu1 %596 }
 0x377   : > { %v598_v58 = vsub.f32 %v589_v46, %v597_v57 }
 0x378   : > { %v883_v59 = vpop.eup %882 }
 0x379   : > { %v599_v60 = vmul.f32 1.442695, %v598_v58  ;;  %v363_v61 = vsel %vm190_vm1, %v883_v59, 0.0 }
 0x37a   : > { %364 = vadd.xlane.f32.xlu0 %v363_v61  ;;  %v370_v62 = vpop.permute.xlu1 %369 }
 0x37b   : > { %886 = vpow2.f32 %v599_v60  ;;  %v375_v63 = vsel %vm257_vm2, %v370_v62, 0 }
 0x37c   : > { %811 = vmatpush3.bf16.msra.mxu0 %v375_v63 }
 0x37d   : > { %822 = vmatprep.subr.bf16.mxu0 %v918_v0 }
 0x380   : > { %v885_v1 = vpop.eup %884 }
 0x381   : > { %v482_v2 = vsel %vm190_vm1, %v885_v1, 0.0 }
 0x382   : > { %483 = vadd.xlane.f32.xlu1 %v482_v2 }
 0x388   : > { %v887_v3 = vpop.eup %886 }
 0x389   : > { %v601_v4 = vsel %vm190_vm1, %v887_v3, 0.0 }
 0x38a   : > { %602 = vadd.xlane.f32.xlu0 %v601_v4 }
 0x393   : > { %607 = vrot.lane.b32.xlu1 %v985_v9, %s925_s28 }
 0x3a0   : > { %488 = vrot.lane.b32.xlu0 %v985_v9, %s926_s29 }
 0x403   : > { %v365_v5 = vpop.xlane.xlu0 %364 }
 0x404   : > { %888 = vrcp.f32 %v365_v5 }
 0x40b   : > { %v484_v6 = vpop.xlane.xlu1 %483 }
 0x40c   : > { %890 = vrcp.f32 %v484_v6 }
 0x40f   : > { %v608_v9 = vpop.permute.xlu1 %607 }
 0x410   : > { %v613_v17 = vsel %vm257_vm2, %v608_v9, 0 }
 0x411   : > { %v889_v7 = vpop.eup %888 }
 0x412   : > { %v367_v8 = vmul.f32 %v889_v7, %v883_v59 }
 0x413   : > { %v603_v10 = vpop.xlane.xlu0 %602 }
 0x414   : > { %892 = vrcp.f32 %v603_v10  ;;  %v368_v11 = vpack.c.bf16 %v367_v8, %v367_v8 }
 0x416   : > { %813 = vmatmul.mubr.msk.bf16.vlgmr.msra.gmra.mxu0 %vm190_vm1, %v368_v11 }
 0x417   : > { %v489_v12 = vpop.permute.xlu0 %488  ;;  %824 = vmatprep.mubr.msk.bf16.mxu0 %vm919_vm0, %v918_v0 }
 0x418   : > { %v494_v13 = vsel %vm257_vm2, %v489_v12, 0 }
 0x419   : > { %v891_v14 = vpop.eup %890  ;;  %823 = vmatpush3.bf16.msra.mxu0 %v494_v13 }
 0x41a   : > { %v486_v15 = vmul.f32 %v891_v14, %v885_v1  ;;  %834 = vmatprep.subr.bf16.mxu0 %v918_v0 }
 0x41c   : > { %v487_v16 = vpack.c.bf16 %v486_v15, %v486_v15 }
 0x41e   : > { %825 = vmatmul.mubr.msk.bf16.vlgmr.msra.gmra.mxu0 %vm190_vm1, %v487_v16 }
 0x41f   : > { %835 = vmatpush3.bf16.msra.mxu0 %v613_v17  ;;  %836 = vmatprep.mubr.msk.bf16.mxu0 %vm919_vm0, %v918_v0 }
 0x421   : > { %v893_v18 = vpop.eup %892 }
 0x422   : > { %v605_v19 = vmul.f32 %v893_v18, %v887_v3 }
 0x424   : > { %v606_v20 = vpack.c.bf16 %v605_v19, %v605_v19 }
 0x426   : > { %837 = vmatmul.mubr.msk.bf16.vlgmr.msra.gmra.mxu0 %vm190_vm1, %v606_v20 }
 0x4d6   : > { %v411_v21 = vpop.f32.mrf.mxu0 }
 0x4d7   : > { %v773_v22 = vpack.c.bf16 %v411_v21, %v411_v21 }
 0x4d8   : > { %v814_v23 = vpop.f32.mrf.mxu0 }
 0x4d9   : > { %421 = vrot.lane.b32.xlu1 %v773_v22, %s927_s30 }
 0x4da   : > { %v414_v24 = vpop.f32.mrf.mxu0 }
 0x4dc   : > { %v815_v25 = vpop.f32.mrf.mxu0 }
 0x4de   : > { %v530_v26 = vpop.f32.mrf.mxu0 }
 0x4df   : > { %v774_v27 = vpack.c.bf16 %v530_v26, %v530_v26 }
 0x4e0   : > { %v826_v28 = vpop.f32.mrf.mxu0 }
 0x4e1   : > { %540 = vrot.lane.b32.xlu0 %v774_v27, %s928_s3 }
 0x4e2   : > { %v533_v0 = vpop.f32.mrf.mxu0 }
 0x4e4   : > { %v827_v29 = vpop.f32.mrf.mxu0 }
 0x4e6   : > { %v649_v30 = vpop.f32.mrf.mxu0 }
 0x4e7   : > { %v775_v31 = vpack.c.bf16 %v649_v30, %v649_v30 }
 0x4e8   : > { %v838_v32 = vpop.f32.mrf.mxu0 }
 0x4e9   : > { %659 = vrot.lane.b32.xlu1 %v775_v31, %s929_s4 }
 0x4ea   : > { %v652_v33 = vpop.f32.mrf.mxu0 }
 0x4ec   : > { %v839_v34 = vpop.f32.mrf.mxu0 }
 0x54b   : > { %v422_v35 = vpop.permute.xlu1 %421 }
 0x54c   : > { %425 = vst.msk [vmem:[%s1013_s26] sm:$0xf] %vm424_vm4, %v422_v35 }
 0x553   : > { %v541_v36 = vpop.permute.xlu0 %540 }
 0x554   : > { %544 = vst.msk [vmem:[%s1013_s26] sm:$0xf] %vm543_vm5, %v541_v36 }
 0x55b   : > { %v660_v37 = vpop.permute.xlu1 %659 }
 0x55c   : > { %663 = vst.msk [vmem:[%s1013_s26] sm:$0xf] %vm662_vm6, %v660_v37 }
 0x55d PF: > { %s12_s11 = sadd.s32 1, %s916_s11   ;;  %s1052_s9 = smov %s912_s10 }
 0x55e   : > { %p9_p5 = scmp.ge.s32.totalorder %s12_s11, 4   ;;  %s1053_s10 = smov %s1055_s12 }
 0x560   :  { %11 = sbr.rel (!%p9_p5) target bundleno = 2 (0x2), region = 61 }

// kernel: decoder_layer.13
= control target key start
LH: loop header
LB: loop body
LE: loop exit
PB: predicated region body
PF: predicated region fallthrough
CT: control target
= control target key end

     0   :  { %v348_v1 = vmov 0.0   ;;  %vm349_vm0 = vmmov 0   ;;  %vm34_vm1 = vcmask 261120   ;;  %s443_s0 = inlined_call_operand.vmem [shape: f32[16,32], index: 0, kind: input, shape index: {}]   ;;  %s444_s1 = inlined_call_operand.vmem [shape: bf16[32,64], index: 1, kind: input, shape index: {}]   ;;  %s445_s2 = inlined_call_operand.vmem [shape: f32[1,64], index: 2, kind: input, shape index: {}]   ;;  %s446_s3 = inlined_call_operand.vmem [shape: bf16[64,32], index: 3, kind: input, shape index: {}]   ;;  %s447_s4 = inlined_call_operand.vmem [shape: f32[1,32], index: 4, kind: input, shape index: {}]   ;;  %s448_s5 = inlined_call_operand.vmem [shape: f32[1,32], index: 5, kind: input, shape index: {}]   ;;  %s449_s6 = inlined_call_operand.vmem [shape: f32[1,32], index: 6, kind: input, shape index: {}]   ;;  %s450_s7 = inlined_call_operand.hbm [shape: f32[16,32], index: 7, kind: output, shape index: {}]  }
   0x1   :  { %v316_v0 = vld [vmem:[%s444_s1 + $0x8] sm:$0xff]   ;;  %291 = vmatprep.subr.bf16.mxu0 %v348_v1  ;;  %v317_v2 = vld [vmem:[%s444_s1] sm:$0xff]   ;;  %299 = vmatprep.subr.bf16.mxu1 %v348_v1  ;;  %35 = vst.msk [vmem:[#allocation2] sm:$0xff] %vm34_vm1, %v348_v1  ;;  %36 = vst.msk [vmem:[#allocation2 + $0x8] sm:$0xff] %vm34_vm1, %v348_v1 }
   0x2   :  { %292 = vmatpush3.bf16.msra.mxu0 %v316_v0  ;;  %295 = vmatprep.mubr.msk.bf16.mxu0 %vm349_vm0, %v348_v1  ;;  %v28_v3 = vld [vmem:[%s443_s0] sm:$0xff]  ;;  %v29_v4 = vld [vmem:[%s443_s0 + $0x8] sm:$0xff]  ;;  %v318_v5 = vld [vmem:[%s446_s3 + $0x18] sm:$0xff]  }
   0x3   :  { %293 = vmatprep.subr.bf16.mxu0 %v348_v1  ;;  %307 = vmatprep.mubr.msk.bf16.mxu1 %vm349_vm0, %v348_v1  ;;  %v37_v6 = vpack.c.bf16 %v29_v4, %v28_v3 }
   0x4   :  { %300 = vmatpush3.bf16.msra.mxu1 %v318_v5 }
   0x5   :  { %301 = vmatprep.subr.bf16.mxu1 %v348_v1 }
   0x6   :  { %294 = vmatpush3.bf16.msra.mxu0 %v317_v2 }
   0x7   :  { %12 = vsyncpa [#allocation4], 0  ;;  %v319_v7 = vld [vmem:[%s446_s3 + $0x10] sm:$0xff]   ;;  %v320_v8 = vld [vmem:[%s446_s3 + $0x8] sm:$0xff]   ;;  %vm143_vm2 = vcmask 523264   ;;  %s350_s20 = smov [#allocation3]  }
   0x8   :  { %302 = vmatpush3.bf16.msra.mxu1 %v319_v7  ;;  %v321_v9 = vld [vmem:[%s446_s3] sm:$0xff]   ;;  %v109_v24 = vld [vmem:[#allocation2 + $0x8] sm:$0xff]  ;;  %s260_s21 = sshll.u32 %s350_s20, 4  ;;  %s261_s21 = int_to_ptr.vmem [resolvable:$true] %s260_s21 }
   0x9   :  { %296 = vmatmul.mubr.msk.bf16.vlgmr.msra.gmra.mxu0 %vm34_vm1, %v37_v6  ;;  %303 = vmatprep.subr.bf16.mxu1 %v348_v1  ;;  %v271_v10 = vld [vmem:[%s445_s2] ss:$0 sm:$0xff]  ;;  %s326_s22 = scalar_lea.vmem %s261_s21, 256  ;;  %p331_p1 = scmp.lt.s32.totalorder %s261_s21, %s261_s21 }
   0xa   :  { %v108_v20 = vld [vmem:[#allocation2] sm:$0xff]  ;;  %p327_p0 = scmp.ne.s32.totalorder %s261_s21, %s326_s22  ;;  %p332_p2 = scmp.lt.s32.totalorder %s326_s22, %s326_s22 }
   0xb   :  { %v280_v28 = vld [vmem:[%s447_s4] ss:$0 sm:$0xff] }
   0xc   :  { %304 = vmatpush3.bf16.msra.mxu1 %v320_v8  ;;  %v281_v54 = vld [vmem:[%s448_s5] ss:$0 sm:$0xff]  ;;  %p333_p3 = por %p332_p2, %p331_p1 }
   0xd   :  { %305 = vmatprep.subr.bf16.mxu1 %v348_v1  ;;  %v282_v56 = vld [vmem:[%s449_s6] ss:$0 sm:$0xff] }
   0xe   :  { %p334_p4 = pnand %p333_p3, %p327_p0 }
  0x10   :  { %306 = vmatpush3.bf16.msra.mxu1 %v321_v9 }
  0xc9   :  { %v99_v11 = vpop.f32.mrf.mxu0 }
  0xca   :  { %v100_v13 = vadd.f32 %v271_v10, %v99_v11 }
  0xcb   :  { %v297_v12 = vpop.f32.mrf.mxu0 }
  0xcc   :  { %v106_v17 = vmax.f32 %v100_v13, 0.0 }
  0xcd   :  { %v102_v14 = vpop.f32.mrf.mxu0 }
  0xce   :  { %v103_v15 = vadd.f32 %v271_v10, %v102_v14 }
  0xcf   :  { %v298_v16 = vpop.f32.mrf.mxu0 }
  0xd0   :  { %v107_v18 = vmax.f32 %v103_v15, 0.0 }
  0xd2   :  { %v110_v19 = vpack.c.bf16 %v107_v18, %v106_v17 }
  0xd4   :  { %308 = vmatmul.mubr.msk.bf16.vlgmr.msra.gmra.mxu1 %vm143_vm2, %v110_v19 }
 0x194   :  { %v181_v21 = vpop.f32.mrf.mxu1 }
 0x195   :  { %v188_v22 = vadd.f32 %v181_v21, %v108_v20 }
 0x196   :  { %v309_v23 = vpop.f32.mrf.mxu1 }
 0x197   :  { %190 = vst.msk [vmem:[#allocation2] sm:$0xff] %vm34_vm1, %v188_v22 }
 0x198   :  { %v184_v25 = vpop.f32.mrf.mxu1 }
 0x199   :  { %v189_v26 = vadd.f32 %v184_v25, %v109_v24 }
 0x19a   :  { %v310_v27 = vpop.f32.mrf.mxu1 }
 0x19b   :  { %191 = vst.msk [vmem:[#allocation2 + $0x8] sm:$0xff] %vm34_vm1, %v189_v26 }
 0x19e   :  { %v195_v29 = vld [vmem:[#allocation2] sm:$0xff] }
 0x19f   :  { %v204_v30 = vadd.f32 %v280_v28, %v195_v29 }
 0x1a1   :  { %v206_v31 = vadd.f32 %v204_v30, %v28_v3 }
 0x1a2   :  { %v196_v32 = vld [vmem:[#allocation2 + $0x8] sm:$0xff] }
 0x1a3   :  { %v210_v33 = vsel %vm34_vm1, %v206_v31, 0.0  ;;  %v205_v34 = vadd.f32 %v280_v28, %v196_v32 }
 0x1a4   :  { %211 = vadd.xlane.f32.xlu0 %v210_v33 }
 0x1a5   :  { %v207_v35 = vadd.f32 %v205_v34, %v29_v4 }
 0x1a7   :  { %v213_v36 = vsel %vm34_vm1, %v207_v35, 0.0 }
 0x1a8   :  { %214 = vadd.xlane.f32.xlu0 %v213_v36 }
 0x22d   :  { %v212_v37 = vpop.xlane.xlu0 %211 }
 0x22e   :  { %v217_v38 = vmul.f32 0.03125, %v212_v37 }
 0x230   :  { %v219_v39 = vsub.f32 %v206_v31, %v217_v38 }
 0x231   :  { %v215_v40 = vpop.xlane.xlu0 %214 }
 0x232   :  { %v218_v41 = vmul.f32 0.03125, %v215_v40  ;;  %v221_v42 = vmul.f32 %v219_v39, %v219_v39 }
 0x234   :  { %v220_v43 = vsub.f32 %v207_v35, %v218_v41  ;;  %v223_v44 = vsel %vm34_vm1, %v221_v42, 0.0 }
 0x235   :  { %224 = vadd.xlane.f32.xlu1 %v223_v44 }
 0x236   :  { %v222_v45 = vmul.f32 %v220_v43, %v220_v43 }
 0x238   :  { %v226_v46 = vsel %vm34_vm1, %v222_v45, 0.0 }
 0x239   :  { %227 = vadd.xlane.f32.xlu1 %v226_v46 }
 0x2be   :  { %v225_v47 = vpop.xlane.xlu1 %224 }
 0x2bf   :  { %v229_v48 = vmul.f32 0.03125, %v225_v47 }
 0x2c1   :  { %v231_v49 = vadd.f32 1e-05, %v229_v48 }
 0x2c2   :  { %v228_v50 = vpop.xlane.xlu1 %227 }
 0x2c3   :  { %322 = vrsqrt.f32 %v231_v49  ;;  %v230_v51 = vmul.f32 0.03125, %v228_v50 }
 0x2c5   :  { %v232_v52 = vadd.f32 1e-05, %v230_v51 }
 0x2c7   :  { %324 = vrsqrt.f32 %v232_v52 }
 0x2d0   :  { %v323_v53 = vpop.eup %322 }
 0x2d1   :  { %v235_v55 = vmul.f32 %v323_v53, %v219_v39 }
 0x2d3   :  { %v243_v57 = vmul.f32 %v281_v54, %v235_v55 }
 0x2d4   :  { %v325_v58 = vpop.eup %324 }
 0x2d5   :  { %v236_v59 = vmul.f32 %v325_v58, %v220_v43  ;;  %v251_v60 = vadd.f32 %v282_v56, %v243_v57 }
 0x2d7   :  { %v244_v61 = vmul.f32 %v281_v54, %v236_v59  ;;  %253 = vst.msk [vmem:[#allocation3] sm:$0xff] %vm34_vm1, %v251_v60 }
 0x2d9   :  { %v252_v62 = vadd.f32 %v282_v56, %v244_v61 }
 0x2db   :  { %254 = vst.msk [vmem:[#allocation3 + $0x8] sm:$0xff] %vm34_vm1, %v252_v62 }
 0x2dc   :  { %337 = shalt.err (!%p334_p4)
}
 0x2dd   :  { %s351_s5 = smov 128   ;;  %s352_s6 = smov 8  }
 0x2de   :  { %266 = dma.vmem_to_hbm [thread:$0]  %s261_s21, 256, %s450_s7, [#allocation4], %s351_s5, %s351_s5, %s352_s6  }
 0x2df   :  { %346 = dma.done.wait [#allocation4], 256  }
 0x2e0   :  { %347 = vsyncadd [#allocation4], 4294967040 }
 0x2e1   :  { %270 = vsyncpa [#allocation4], 1 }

</bundles_post_ra>
